<compile_context>
chip_gen: v6e
topology: v6e:2x2x1
jax: 0.10.0
libtpu: 0.0.40
codegen_flags: <defaults>
</compile_context>

<pallas_src>
import functools

import jax
import jax.numpy as jnp
from jax.experimental import pallas as pl
from jax.experimental.pallas import tpu as pltpu

# ----------------------- hyper-parameters (small) -------------------------
VOCAB_SIZE = 65
N_EMBED = 32
BLOCK_SIZE = 8          # max sequence length (T)
N_HEAD = 4
N_LAYER = 2
HEAD_SIZE = N_EMBED // N_HEAD
EPS = 1e-5              # nn.LayerNorm default
VOCAB_PAD = 128         # lane-dense padded vocab (token table and lm_head)
NEG_INF = -1e30         # finite mask sentinel
# DROPOUT = 0.0 (identity in eval mode)

# ------------------- packed weight-slab layout constants ------------------
OFF_QKV = 0                       # (D, 3D)  q|k|v weights (ln1 + scale folded)
OFF_WP = 128                      # (D, D)   attention output projection
OFF_W1 = 256                      # (D, 4D)  FFN first linear (ln2 folded)
LAYER_COLS = 384                  # 128-lane-aligned slots per layer
OFF_LM = N_LAYER * LAYER_COLS     # (D, VOCAB_PAD) lm_head (ln_f folded)
WA_COLS = OFF_LM + VOCAB_PAD      # = 896 lanes total in slab A

WB_ROWS = VOCAB_PAD + N_LAYER * 4 * N_EMBED   # token table + stacked w2's = 384
BIAS_ROWS = 1 + 4 * N_LAYER                   # lm_b + 4 bias rows per layer = 9


# ----------------------------- kernel helpers -----------------------------
def _norm(x):
    """LayerNorm with gamma/beta folded into the following linear (pack time)."""
    mu = jnp.mean(x, axis=-1, keepdims=True)
    var = jnp.mean((x - mu) ** 2, axis=-1, keepdims=True)
    return (x - mu) * jax.lax.rsqrt(var + EPS)


def _layernorm(x, gamma, beta):
    """Full PyTorch nn.LayerNorm semantics — used by the pure-JAX reference."""
    mu = jnp.mean(x, axis=-1, keepdims=True)
    var = jnp.mean((x - mu) ** 2, axis=-1, keepdims=True)
    return (x - mu) * jax.lax.rsqrt(var + EPS) * gamma + beta


def _softmax(x):
    m = jnp.max(x, axis=-1, keepdims=True)
    e = jnp.exp(x - m)
    return e * pl.reciprocal(jnp.sum(e, axis=-1, keepdims=True), approx=True)


# --------------------- single fused forward kernel ------------------------
def gpt_fused_kernel(idx_ref, pos_ref, wa_ref, wb_ref, b_ref, o_ref, *, seq_len):
    BTb = idx_ref.shape[0]          # rows handled by this grid block
    T = seq_len
    Bb = BTb // T                   # batch elements in this block
    D = N_EMBED
    H, HS = N_HEAD, HEAD_SIZE

    bias = b_ref[...]               # (9, 128) f32, whole slab resident

    # ---- embedding: one-hot gather on the MXU + pre-tiled positional add ----
    ids = idx_ref[...]                                            # (BTb, 1) i32
    lane = jax.lax.broadcasted_iota(jnp.int32, (BTb, VOCAB_PAD), 1)
    onehot = (lane == ids).astype(jnp.bfloat16)                   # (BTb, 128)
    x = jnp.dot(onehot, wb_ref[0:VOCAB_PAD, :],
                preferred_element_type=jnp.float32)               # (BTb, D) f32
    x = x + pos_ref[...]                                          # flat add

    # ---- additive causal mask built once for the whole forward -------------
    r = jax.lax.broadcasted_iota(jnp.int32, (T, T), 0)
    c = jax.lax.broadcasted_iota(jnp.int32, (T, T), 1)
    amask = jnp.where(r >= c, 0.0, NEG_INF).astype(jnp.float32)[None]  # (1,T,T)

    # ---- transformer blocks (static unroll, everything stays in VMEM) ------
    for l in range(N_LAYER):
        col = l * LAYER_COLS
        wqkv = wa_ref[:, col + OFF_QKV: col + OFF_QKV + 3 * D]    # (D, 3D) bf16
        wp = wa_ref[:, col + OFF_WP: col + OFF_WP + D]            # (D, D)  bf16
        w1 = wa_ref[:, col + OFF_W1: col + OFF_W1 + 4 * D]        # (D, 4D) bf16
        w2 = wb_ref[VOCAB_PAD + l * 4 * D: VOCAB_PAD + (l + 1) * 4 * D, :]
        bqkv = bias[1 + 4 * l: 2 + 4 * l, 0: 3 * D]               # (1, 3D)
        bp = bias[2 + 4 * l: 3 + 4 * l, 0: D]                     # (1, D)
        bf1 = bias[3 + 4 * l: 4 + 4 * l, 0: 4 * D]                # (1, 4D)
        bf2 = bias[4 + 4 * l: 5 + 4 * l, 0: D]                    # (1, D)

        # -- multi-head causal self-attention (ln1 + C**-0.5 pre-folded) --
        xn = _norm(x).astype(jnp.bfloat16)
        qkv = jnp.dot(xn, wqkv, preferred_element_type=jnp.float32) + bqkv
        heads = []
        for h in range(H):                                        # static, 4 iters
            q_h = qkv[:, h * HS:(h + 1) * HS].reshape(Bb, T, HS).astype(jnp.bfloat16)
            k_h = qkv[:, D + h * HS:D + (h + 1) * HS].reshape(Bb, T, HS).astype(jnp.bfloat16)
            v_h = qkv[:, 2 * D + h * HS:2 * D + (h + 1) * HS].reshape(Bb, T, HS).astype(jnp.bfloat16)
            s = jnp.einsum('bqd,bkd->bqk', q_h, k_h,
                           preferred_element_type=jnp.float32)    # (Bb, T, T)
            p = _softmax(s + amask)                               # f32
            heads.append(jnp.einsum('bqk,bkd->bqd', p.astype(jnp.bfloat16), v_h,
                                    preferred_element_type=jnp.float32))
        # one lane-concat + ONE (BTb,D)@(D,D) projection matmul per layer
        o = jnp.concatenate(heads, axis=-1).reshape(BTb, D).astype(jnp.bfloat16)
        x = x + jnp.dot(o, wp, preferred_element_type=jnp.float32) + bp

        # -- feed-forward (ln2 pre-folded into w1/bf1) --
        xn = _norm(x).astype(jnp.bfloat16)
        hdn = jnp.dot(xn, w1, preferred_element_type=jnp.float32) + bf1
        hdn = jnp.maximum(hdn, 0.0).astype(jnp.bfloat16)          # ReLU
        x = x + jnp.dot(hdn, w2, preferred_element_type=jnp.float32) + bf2

    # ---- final LN (folded) + lm_head, lane-dense padded output --------------
    xn = _norm(x).astype(jnp.bfloat16)
    lmw = wa_ref[:, OFF_LM: OFF_LM + VOCAB_PAD]                   # (D, 128) bf16
    lmb = bias[0:1, :]                                            # (1, 128)
    o_ref[...] = (jnp.dot(xn, lmw, preferred_element_type=jnp.float32)
                  + lmb).astype(o_ref.dtype)                      # (BTb, 128)


# ------------------------------ parameters --------------------------------
def init_params(key):
    keys = list(jax.random.split(key, 32))
    it = iter(keys)

    def nrm(shape, std=0.02):
        return jax.random.normal(next(it), shape, jnp.float32) * std

    params = {
        "tok": nrm((VOCAB_SIZE, N_EMBED)),
        "pos": nrm((BLOCK_SIZE, N_EMBED)),
        "lnf_g": jnp.ones((1, N_EMBED), jnp.float32),
        "lnf_b": jnp.zeros((1, N_EMBED), jnp.float32),
        "lm_w": nrm((N_EMBED, VOCAB_SIZE)),
        "lm_b": jnp.zeros((1, VOCAB_SIZE), jnp.float32),
        "blocks": [],
    }
    for _ in range(N_LAYER):
        params["blocks"].append(dict(
            g1=jnp.ones((1, N_EMBED), jnp.float32),
            b1=jnp.zeros((1, N_EMBED), jnp.float32),
            wk=nrm((N_EMBED, N_EMBED)),
            wq=nrm((N_EMBED, N_EMBED)),
            wv=nrm((N_EMBED, N_EMBED)),
            wp=nrm((N_EMBED, N_EMBED)),
            bp=jnp.zeros((1, N_EMBED), jnp.float32),
            g2=jnp.ones((1, N_EMBED), jnp.float32),
            b2=jnp.zeros((1, N_EMBED), jnp.float32),
            w1=nrm((N_EMBED, 4 * N_EMBED)),
            bfc1=jnp.zeros((1, 4 * N_EMBED), jnp.float32),
            w2=nrm((4 * N_EMBED, N_EMBED)),
            bfc2=jnp.zeros((1, N_EMBED), jnp.float32),
        ))
    return params


def pack_params(params):
    """One-time wrapper-side layout plumbing + constant folding.

    * folds the C**-0.5 score scale into the q columns of wqkv,
    * folds LayerNorm gamma/beta into the linear that consumes its output,
    * packs everything into 3 slabs: wa (D-row weights, bf16),
      wb (token table + w2 stack, bf16), bias (all biases, f32).
    """
    D, L = N_EMBED, N_LAYER
    blocks = params["blocks"]

    def fold_ln(gamma, beta, w, b=None):
        # LN(x) @ w + b  ==  norm(x) @ (gamma^T * w) + (beta @ w + b)
        w_f = gamma.reshape(-1, 1) * w
        b_f = beta.reshape(1, -1) @ w
        if b is not None:
            b_f = b_f + b
        return w_f, b_f

    wa = jnp.zeros((D, WA_COLS), jnp.float32)
    wb = jnp.zeros((WB_ROWS, D), jnp.float32)
    bias = jnp.zeros((BIAS_ROWS, 128), jnp.float32)

    # padded token embedding table (rows 0:VOCAB_SIZE of wb)
    wb = wb.at[:VOCAB_SIZE, :].set(params["tok"])

    for l, blk in enumerate(blocks):
        col = l * LAYER_COLS
        wqkv = jnp.concatenate(
            [blk["wq"] * (float(N_EMBED) ** -0.5), blk["wk"], blk["wv"]], axis=-1)
        wqkv_f, bqkv = fold_ln(blk["g1"], blk["b1"], wqkv)                 # ln1
        w1_f, bf1 = fold_ln(blk["g2"], blk["b2"], blk["w1"], blk["bfc1"])  # ln2
        wa = wa.at[:, col + OFF_QKV: col + OFF_QKV + 3 * D].set(wqkv_f)
        wa = wa.at[:, col + OFF_WP: col + OFF_WP + D].set(blk["wp"])
        wa = wa.at[:, col + OFF_W1: col + OFF_W1 + 4 * D].set(w1_f)
        wb = wb.at[VOCAB_PAD + l * 4 * D: VOCAB_PAD + (l + 1) * 4 * D, :].set(blk["w2"])
        bias = bias.at[1 + 4 * l, :3 * D].set(bqkv[0])
        bias = bias.at[2 + 4 * l, :D].set(blk["bp"][0])
        bias = bias.at[3 + 4 * l, :4 * D].set(bf1[0])
        bias = bias.at[4 + 4 * l, :D].set(blk["bfc2"][0])

    lmw_f, lmb = fold_ln(params["lnf_g"], params["lnf_b"],
                         params["lm_w"], params["lm_b"])                   # ln_f
    wa = wa.at[:, OFF_LM: OFF_LM + VOCAB_SIZE].set(lmw_f)
    bias = bias.at[0, :VOCAB_SIZE].set(lmb[0])

    return dict(
        wa=wa.astype(jnp.bfloat16),     # bf16 MXU operands, f32 accumulation
        wb=wb.astype(jnp.bfloat16),
        bias=bias,                      # biases stay f32 (added post-accum)
        pos=params["pos"],
    )


# ------------------------------- forward ----------------------------------
def gpt_forward(packed, idx, targets=None):
    B, T = idx.shape
    BT = B * T
    idx2 = idx.reshape(BT, 1).astype(jnp.int32)
    pos_bt = jnp.tile(packed["pos"][:T], (B, 1))        # pre-tiled (BT, D)

    # Split the batch into 2 blocks over a "parallel" grid axis when possible,
    # so v7x's two TensorCores each take half.  Weight slabs use a constant
    # index_map (resident across iterations).  Single block otherwise.
    n_blk = 2 if (B % 2 == 0 and B >= 2 and (BT // 2) % 8 == 0) else 1
    bt_blk = BT // n_blk

    kernel = functools.partial(gpt_fused_kernel, seq_len=T)
    logits_p = pl.pallas_call(
        kernel,
        grid=(n_blk,),
        in_specs=[
            pl.BlockSpec((bt_blk, 1), lambda i: (i, 0)),            # idx
            pl.BlockSpec((bt_blk, N_EMBED), lambda i: (i, 0)),      # pos (tiled)
            pl.BlockSpec((N_EMBED, WA_COLS), lambda i: (0, 0)),     # weight slab A
            pl.BlockSpec((WB_ROWS, N_EMBED), lambda i: (0, 0)),     # weight slab B
            pl.BlockSpec((BIAS_ROWS, 128), lambda i: (0, 0)),       # bias slab
        ],
        out_specs=pl.BlockSpec((bt_blk, VOCAB_PAD), lambda i: (i, 0)),
        out_shape=jax.ShapeDtypeStruct((BT, VOCAB_PAD), jnp.float32),
        compiler_params=pltpu.CompilerParams(
            dimension_semantics=("parallel",)),
    )(idx2, pos_bt, packed["wa"], packed["wb"], packed["bias"])

    logits = logits_p[:, :VOCAB_SIZE].reshape(B, T, VOCAB_SIZE)

    loss = None
    if targets is not None:  # plain-JAX glue, matches F.cross_entropy
        lp = jax.nn.log_softmax(logits.reshape(BT, VOCAB_SIZE), axis=-1)
        loss = -jnp.mean(jnp.take_along_axis(lp, targets.reshape(BT, 1), axis=1))
    return logits, loss


# ------------------------- pure-JAX reference ------------------------------
def gpt_forward_ref(params, idx):
    B, T = idx.shape
    x = params["tok"][idx] + params["pos"][:T][None]
    causal = jnp.tril(jnp.ones((T, T), bool))
    for blk in params["blocks"]:
        xn = _layernorm(x, blk["g1"], blk["b1"])
        k = xn @ blk["wk"]; q = xn @ blk["wq"]; v = xn @ blk["wv"]
        outs = []
        for h in range(N_HEAD):
            sl = slice(h * HEAD_SIZE, (h + 1) * HEAD_SIZE)
            wei = jnp.einsum("btd,bsd->bts", q[..., sl], k[..., sl]) * (N_EMBED ** -0.5)
            wei = jnp.where(causal[None], wei, -jnp.inf)
            wei = jax.nn.softmax(wei, axis=-1)
            outs.append(jnp.einsum("bts,bsd->btd", wei, v[..., sl]))
        x = x + jnp.concatenate(outs, -1) @ blk["wp"] + blk["bp"]
        xn = _layernorm(x, blk["g2"], blk["b2"])
        h1 = jnp.maximum(xn @ blk["w1"] + blk["bfc1"], 0.0)
        x = x + h1 @ blk["w2"] + blk["bfc2"]
    xn = _layernorm(x, params["lnf_g"], params["lnf_b"])
    return xn @ params["lm_w"] + params["lm_b"]


# --------------------------------- main ------------------------------------
if __name__ == "__main__":
    key = jax.random.PRNGKey(0)
    pkey, ikey = jax.random.split(key)
    params = init_params(pkey)
    packed = pack_params(params)

    B, T = 2, BLOCK_SIZE
    idx = jax.random.randint(ikey, (B, T), 0, VOCAB_SIZE, dtype=jnp.int32)

    logits, loss = gpt_forward(packed, idx)
    logits = jax.block_until_ready(logits)

    assert logits.shape == (B, T, VOCAB_SIZE)
    ref = jax.block_until_ready(gpt_forward_ref(params, idx))
    assert jnp.allclose(logits, ref, rtol=1e-2, atol=1e-2), "mismatch vs reference"

    print("KERNEL_OK")
</pallas_src>

<mosaic_0001>
module attributes {stable_mosaic.version = 11 : i64} {
  func.func @gpt_fused_kernel(%arg0: i32, %arg1: memref<8x1xi32, #tpu.memory_space<vmem>>, %arg2: memref<8x32xf32, #tpu.memory_space<vmem>>, %arg3: memref<32x896xbf16, #tpu.memory_space<vmem>>, %arg4: memref<384x32xbf16, #tpu.memory_space<vmem>>, %arg5: memref<9x128xf32, #tpu.memory_space<vmem>>, %arg6: memref<8x128xf32, #tpu.memory_space<vmem>>) attributes {dimension_semantics = [#tpu.dimension_semantics<parallel>], iteration_bounds = array<i64: 2>, scalar_prefetch = 0 : i64, scratch_operands = 0 : i64, tpu.core_type = #tpu.core_type<tc>, window_params = [{transform_indices = @transform_0, window_bounds = array<i64: 8, 1>}, {transform_indices = @transform_1, window_bounds = array<i64: 8, 32>}, {pipeline_mode = #tpu.pipeline_mode<synchronous>, transform_indices = @transform_2, window_bounds = array<i64: 32, 896>}, {pipeline_mode = #tpu.pipeline_mode<synchronous>, transform_indices = @transform_3, window_bounds = array<i64: 384, 32>}, {pipeline_mode = #tpu.pipeline_mode<synchronous>, transform_indices = @transform_4, window_bounds = array<i64: 9, 128>}, {transform_indices = @transform_5, window_bounds = array<i64: 8, 128>}]} {
    %c0 = arith.constant 0 : index
    %c0_0 = arith.constant 0 : index
    %0 = vector.load %arg5[%c0, %c0_0] : memref<9x128xf32, #tpu.memory_space<vmem>>, vector<9x128xf32>
    %c0_1 = arith.constant 0 : index
    %c0_2 = arith.constant 0 : index
    %1 = vector.load %arg1[%c0_1, %c0_2] : memref<8x1xi32, #tpu.memory_space<vmem>>, vector<8x1xi32>
    %2 = tpu.iota {dimensions = array<i32: 1>} : vector<8x128xi32>
    %3 = vector.broadcast %1 : vector<8x1xi32> to vector<8x128xi32>
    %4 = arith.cmpi eq, %2, %3 : vector<8x128xi32>
    %5 = arith.extui %4 : vector<8x128xi1> to vector<8x128xi32>
    %6 = arith.sitofp %5 : vector<8x128xi32> to vector<8x128xf32>
    %7 = arith.truncf %6 : vector<8x128xf32> to vector<8x128xbf16>
    %c0_3 = arith.constant 0 : index
    %c0_4 = arith.constant 0 : index
    %8 = vector.load %arg4[%c0_3, %c0_4] : memref<384x32xbf16, #tpu.memory_space<vmem>>, vector<128x32xbf16>
    %cst = arith.constant dense<0.000000e+00> : vector<8x32xf32>
    %9 = tpu.matmul %7, %8, %cst {dimension_numbers = #tpu.dot_dimension_numbers<[1], [0], [0], [1], [0, 0, 1, 1], [], []>} : vector<8x128xbf16>, vector<128x32xbf16>, vector<8x32xf32> -> vector<8x32xf32>
    %c0_5 = arith.constant 0 : index
    %c0_6 = arith.constant 0 : index
    %10 = vector.load %arg2[%c0_5, %c0_6] : memref<8x32xf32, #tpu.memory_space<vmem>>, vector<8x32xf32>
    %11 = arith.addf %9, %10 : vector<8x32xf32>
    %12 = tpu.iota {dimensions = array<i32: 0>} : vector<8x8xi32>
    %13 = tpu.iota {dimensions = array<i32: 1>} : vector<8x8xi32>
    %14 = arith.cmpi sge, %12, %13 : vector<8x8xi32>
    %cst_7 = arith.constant 0.000000e+00 : f32
    %cst_8 = arith.constant -1.000000e+30 : f32
    %15 = vector.broadcast %cst_7 : f32 to vector<8x8xf32>
    %16 = vector.broadcast %cst_8 : f32 to vector<8x8xf32>
    %17 = arith.select %14, %15, %16 : vector<8x8xi1>, vector<8x8xf32>
    %18 = vector.shape_cast %17 : vector<8x8xf32> to vector<1x8x8xf32>
    %c0_9 = arith.constant 0 : index
    %c0_10 = arith.constant 0 : index
    %19 = vector.load %arg3[%c0_9, %c0_10] : memref<32x896xbf16, #tpu.memory_space<vmem>>, vector<32x96xbf16>
    %c0_11 = arith.constant 0 : index
    %c128 = arith.constant 128 : index
    %20 = vector.load %arg3[%c0_11, %c128] : memref<32x896xbf16, #tpu.memory_space<vmem>>, vector<32x32xbf16>
    %c0_12 = arith.constant 0 : index
    %c256 = arith.constant 256 : index
    %21 = vector.load %arg3[%c0_12, %c256] : memref<32x896xbf16, #tpu.memory_space<vmem>>, vector<32x128xbf16>
    %c128_13 = arith.constant 128 : index
    %c0_14 = arith.constant 0 : index
    %22 = vector.load %arg4[%c128_13, %c0_14] : memref<384x32xbf16, #tpu.memory_space<vmem>>, vector<128x32xbf16>
    %23 = vector.extract_strided_slice %0 {offsets = [1, 0], sizes = [1, 96], strides = [1, 1]} : vector<9x128xf32> to vector<1x96xf32>
    %24 = vector.extract_strided_slice %0 {offsets = [2, 0], sizes = [1, 32], strides = [1, 1]} : vector<9x128xf32> to vector<1x32xf32>
    %25 = vector.extract_strided_slice %0 {offsets = [3, 0], sizes = [1, 128], strides = [1, 1]} : vector<9x128xf32> to vector<1x128xf32>
    %26 = vector.extract_strided_slice %0 {offsets = [4, 0], sizes = [1, 32], strides = [1, 1]} : vector<9x128xf32> to vector<1x32xf32>
    %cst_15 = arith.constant dense<0.000000e+00> : vector<8xf32>
    %27 = vector.multi_reduction <add>, %11, %cst_15 [1] : vector<8x32xf32> to vector<8xf32>
    %28 = vector.shape_cast %27 : vector<8xf32> to vector<8x1xf32>
    %cst_16 = arith.constant 3.200000e+01 : f32
    %29 = vector.broadcast %cst_16 : f32 to vector<8x1xf32>
    %30 = arith.divf %28, %29 : vector<8x1xf32>
    %31 = vector.broadcast %30 : vector<8x1xf32> to vector<8x32xf32>
    %32 = arith.subf %11, %31 : vector<8x32xf32>
    %33 = arith.mulf %32, %32 : vector<8x32xf32>
    %cst_17 = arith.constant dense<0.000000e+00> : vector<8xf32>
    %34 = vector.multi_reduction <add>, %33, %cst_17 [1] : vector<8x32xf32> to vector<8xf32>
    %35 = vector.shape_cast %34 : vector<8xf32> to vector<8x1xf32>
    %cst_18 = arith.constant 3.200000e+01 : f32
    %36 = vector.broadcast %cst_18 : f32 to vector<8x1xf32>
    %37 = arith.divf %35, %36 : vector<8x1xf32>
    %38 = vector.broadcast %30 : vector<8x1xf32> to vector<8x32xf32>
    %39 = arith.subf %11, %38 : vector<8x32xf32>
    %cst_19 = arith.constant 9.99999974E-6 : f32
    %40 = vector.broadcast %cst_19 : f32 to vector<8x1xf32>
    %41 = arith.addf %37, %40 : vector<8x1xf32>
    %42 = math.rsqrt %41 : vector<8x1xf32>
    %43 = vector.broadcast %42 : vector<8x1xf32> to vector<8x32xf32>
    %44 = arith.mulf %39, %43 : vector<8x32xf32>
    %45 = arith.truncf %44 : vector<8x32xf32> to vector<8x32xbf16>
    %cst_20 = arith.constant dense<0.000000e+00> : vector<8x96xf32>
    %46 = tpu.matmul %45, %19, %cst_20 {dimension_numbers = #tpu.dot_dimension_numbers<[1], [0], [0], [1], [0, 0, 1, 1], [], []>} : vector<8x32xbf16>, vector<32x96xbf16>, vector<8x96xf32> -> vector<8x96xf32>
    %47 = vector.broadcast %23 : vector<1x96xf32> to vector<8x96xf32>
    %48 = arith.addf %46, %47 : vector<8x96xf32>
    %49 = vector.extract_strided_slice %48 {offsets = [0, 0], sizes = [8, 8], strides = [1, 1]} : vector<8x96xf32> to vector<8x8xf32>
    %50 = vector.shape_cast %49 : vector<8x8xf32> to vector<1x8x8xf32>
    %51 = arith.truncf %50 : vector<1x8x8xf32> to vector<1x8x8xbf16>
    %52 = vector.extract_strided_slice %48 {offsets = [0, 32], sizes = [8, 8], strides = [1, 1]} : vector<8x96xf32> to vector<8x8xf32>
    %53 = vector.shape_cast %52 : vector<8x8xf32> to vector<1x8x8xf32>
    %54 = arith.truncf %53 : vector<1x8x8xf32> to vector<1x8x8xbf16>
    %55 = vector.extract_strided_slice %48 {offsets = [0, 64], sizes = [8, 8], strides = [1, 1]} : vector<8x96xf32> to vector<8x8xf32>
    %56 = vector.shape_cast %55 : vector<8x8xf32> to vector<1x8x8xf32>
    %57 = arith.truncf %56 : vector<1x8x8xf32> to vector<1x8x8xbf16>
    "tpu.trace_start"() <{level = 10 : i32, message = "bqd,bkd->bqk"}> : () -> ()
    %cst_21 = arith.constant dense<0.000000e+00> : vector<1x8x8xf32>
    %58 = tpu.matmul %51, %54, %cst_21 {dimension_numbers = #tpu.dot_dimension_numbers<[2], [2], [1], [1], [0, 0, 0, 1, 1, 1], [0], [0]>} : vector<1x8x8xbf16>, vector<1x8x8xbf16>, vector<1x8x8xf32> -> vector<1x8x8xf32>
    "tpu.trace_stop"() : () -> ()
    %59 = arith.addf %58, %18 : vector<1x8x8xf32>
    %cst_22 = arith.constant dense<0xFF800000> : vector<1x8xf32>
    %60 = vector.multi_reduction <maximumf>, %59, %cst_22 [2] : vector<1x8x8xf32> to vector<1x8xf32>
    %61 = vector.shape_cast %60 : vector<1x8xf32> to vector<1x8x1xf32>
    %62 = vector.broadcast %61 : vector<1x8x1xf32> to vector<1x8x8xf32>
    %63 = arith.subf %59, %62 : vector<1x8x8xf32>
    %64 = math.exp %63 : vector<1x8x8xf32>
    %cst_23 = arith.constant dense<0.000000e+00> : vector<1x8xf32>
    %65 = vector.multi_reduction <add>, %64, %cst_23 [2] : vector<1x8x8xf32> to vector<1x8xf32>
    %66 = vector.shape_cast %65 : vector<1x8xf32> to vector<1x8x1xf32>
    %67 = tpu.reciprocal %66 {approx = true} : vector<1x8x1xf32> -> vector<1x8x1xf32>
    %68 = vector.broadcast %67 : vector<1x8x1xf32> to vector<1x8x8xf32>
    %69 = arith.mulf %64, %68 : vector<1x8x8xf32>
    %70 = arith.truncf %69 : vector<1x8x8xf32> to vector<1x8x8xbf16>
    "tpu.trace_start"() <{level = 10 : i32, message = "bqk,bkd->bqd"}> : () -> ()
    %cst_24 = arith.constant dense<0.000000e+00> : vector<1x8x8xf32>
    %71 = tpu.matmul %70, %57, %cst_24 {dimension_numbers = #tpu.dot_dimension_numbers<[2], [1], [1], [2], [0, 0, 0, 1, 1, 2], [0], [0]>} : vector<1x8x8xbf16>, vector<1x8x8xbf16>, vector<1x8x8xf32> -> vector<1x8x8xf32>
    "tpu.trace_stop"() : () -> ()
    %72 = vector.extract_strided_slice %48 {offsets = [0, 8], sizes = [8, 8], strides = [1, 1]} : vector<8x96xf32> to vector<8x8xf32>
    %73 = vector.shape_cast %72 : vector<8x8xf32> to vector<1x8x8xf32>
    %74 = arith.truncf %73 : vector<1x8x8xf32> to vector<1x8x8xbf16>
    %75 = vector.extract_strided_slice %48 {offsets = [0, 40], sizes = [8, 8], strides = [1, 1]} : vector<8x96xf32> to vector<8x8xf32>
    %76 = vector.shape_cast %75 : vector<8x8xf32> to vector<1x8x8xf32>
    %77 = arith.truncf %76 : vector<1x8x8xf32> to vector<1x8x8xbf16>
    %78 = vector.extract_strided_slice %48 {offsets = [0, 72], sizes = [8, 8], strides = [1, 1]} : vector<8x96xf32> to vector<8x8xf32>
    %79 = vector.shape_cast %78 : vector<8x8xf32> to vector<1x8x8xf32>
    %80 = arith.truncf %79 : vector<1x8x8xf32> to vector<1x8x8xbf16>
    "tpu.trace_start"() <{level = 10 : i32, message = "bqd,bkd->bqk"}> : () -> ()
    %cst_25 = arith.constant dense<0.000000e+00> : vector<1x8x8xf32>
    %81 = tpu.matmul %74, %77, %cst_25 {dimension_numbers = #tpu.dot_dimension_numbers<[2], [2], [1], [1], [0, 0, 0, 1, 1, 1], [0], [0]>} : vector<1x8x8xbf16>, vector<1x8x8xbf16>, vector<1x8x8xf32> -> vector<1x8x8xf32>
    "tpu.trace_stop"() : () -> ()
    %82 = arith.addf %81, %18 : vector<1x8x8xf32>
    %cst_26 = arith.constant dense<0xFF800000> : vector<1x8xf32>
    %83 = vector.multi_reduction <maximumf>, %82, %cst_26 [2] : vector<1x8x8xf32> to vector<1x8xf32>
    %84 = vector.shape_cast %83 : vector<1x8xf32> to vector<1x8x1xf32>
    %85 = vector.broadcast %84 : vector<1x8x1xf32> to vector<1x8x8xf32>
    %86 = arith.subf %82, %85 : vector<1x8x8xf32>
    %87 = math.exp %86 : vector<1x8x8xf32>
    %cst_27 = arith.constant dense<0.000000e+00> : vector<1x8xf32>
    %88 = vector.multi_reduction <add>, %87, %cst_27 [2] : vector<1x8x8xf32> to vector<1x8xf32>
    %89 = vector.shape_cast %88 : vector<1x8xf32> to vector<1x8x1xf32>
    %90 = tpu.reciprocal %89 {approx = true} : vector<1x8x1xf32> -> vector<1x8x1xf32>
    %91 = vector.broadcast %90 : vector<1x8x1xf32> to vector<1x8x8xf32>
    %92 = arith.mulf %87, %91 : vector<1x8x8xf32>
    %93 = arith.truncf %92 : vector<1x8x8xf32> to vector<1x8x8xbf16>
    "tpu.trace_start"() <{level = 10 : i32, message = "bqk,bkd->bqd"}> : () -> ()
    %cst_28 = arith.constant dense<0.000000e+00> : vector<1x8x8xf32>
    %94 = tpu.matmul %93, %80, %cst_28 {dimension_numbers = #tpu.dot_dimension_numbers<[2], [1], [1], [2], [0, 0, 0, 1, 1, 2], [0], [0]>} : vector<1x8x8xbf16>, vector<1x8x8xbf16>, vector<1x8x8xf32> -> vector<1x8x8xf32>
    "tpu.trace_stop"() : () -> ()
    %95 = vector.extract_strided_slice %48 {offsets = [0, 16], sizes = [8, 8], strides = [1, 1]} : vector<8x96xf32> to vector<8x8xf32>
    %96 = vector.shape_cast %95 : vector<8x8xf32> to vector<1x8x8xf32>
    %97 = arith.truncf %96 : vector<1x8x8xf32> to vector<1x8x8xbf16>
    %98 = vector.extract_strided_slice %48 {offsets = [0, 48], sizes = [8, 8], strides = [1, 1]} : vector<8x96xf32> to vector<8x8xf32>
    %99 = vector.shape_cast %98 : vector<8x8xf32> to vector<1x8x8xf32>
    %100 = arith.truncf %99 : vector<1x8x8xf32> to vector<1x8x8xbf16>
    %101 = vector.extract_strided_slice %48 {offsets = [0, 80], sizes = [8, 8], strides = [1, 1]} : vector<8x96xf32> to vector<8x8xf32>
    %102 = vector.shape_cast %101 : vector<8x8xf32> to vector<1x8x8xf32>
    %103 = arith.truncf %102 : vector<1x8x8xf32> to vector<1x8x8xbf16>
    "tpu.trace_start"() <{level = 10 : i32, message = "bqd,bkd->bqk"}> : () -> ()
    %cst_29 = arith.constant dense<0.000000e+00> : vector<1x8x8xf32>
    %104 = tpu.matmul %97, %100, %cst_29 {dimension_numbers = #tpu.dot_dimension_numbers<[2], [2], [1], [1], [0, 0, 0, 1, 1, 1], [0], [0]>} : vector<1x8x8xbf16>, vector<1x8x8xbf16>, vector<1x8x8xf32> -> vector<1x8x8xf32>
    "tpu.trace_stop"() : () -> ()
    %105 = arith.addf %104, %18 : vector<1x8x8xf32>
    %cst_30 = arith.constant dense<0xFF800000> : vector<1x8xf32>
    %106 = vector.multi_reduction <maximumf>, %105, %cst_30 [2] : vector<1x8x8xf32> to vector<1x8xf32>
    %107 = vector.shape_cast %106 : vector<1x8xf32> to vector<1x8x1xf32>
    %108 = vector.broadcast %107 : vector<1x8x1xf32> to vector<1x8x8xf32>
    %109 = arith.subf %105, %108 : vector<1x8x8xf32>
    %110 = math.exp %109 : vector<1x8x8xf32>
    %cst_31 = arith.constant dense<0.000000e+00> : vector<1x8xf32>
    %111 = vector.multi_reduction <add>, %110, %cst_31 [2] : vector<1x8x8xf32> to vector<1x8xf32>
    %112 = vector.shape_cast %111 : vector<1x8xf32> to vector<1x8x1xf32>
    %113 = tpu.reciprocal %112 {approx = true} : vector<1x8x1xf32> -> vector<1x8x1xf32>
    %114 = vector.broadcast %113 : vector<1x8x1xf32> to vector<1x8x8xf32>
    %115 = arith.mulf %110, %114 : vector<1x8x8xf32>
    %116 = arith.truncf %115 : vector<1x8x8xf32> to vector<1x8x8xbf16>
    "tpu.trace_start"() <{level = 10 : i32, message = "bqk,bkd->bqd"}> : () -> ()
    %cst_32 = arith.constant dense<0.000000e+00> : vector<1x8x8xf32>
    %117 = tpu.matmul %116, %103, %cst_32 {dimension_numbers = #tpu.dot_dimension_numbers<[2], [1], [1], [2], [0, 0, 0, 1, 1, 2], [0], [0]>} : vector<1x8x8xbf16>, vector<1x8x8xbf16>, vector<1x8x8xf32> -> vector<1x8x8xf32>
    "tpu.trace_stop"() : () -> ()
    %118 = vector.extract_strided_slice %48 {offsets = [0, 24], sizes = [8, 8], strides = [1, 1]} : vector<8x96xf32> to vector<8x8xf32>
    %119 = vector.shape_cast %118 : vector<8x8xf32> to vector<1x8x8xf32>
    %120 = arith.truncf %119 : vector<1x8x8xf32> to vector<1x8x8xbf16>
    %121 = vector.extract_strided_slice %48 {offsets = [0, 56], sizes = [8, 8], strides = [1, 1]} : vector<8x96xf32> to vector<8x8xf32>
    %122 = vector.shape_cast %121 : vector<8x8xf32> to vector<1x8x8xf32>
    %123 = arith.truncf %122 : vector<1x8x8xf32> to vector<1x8x8xbf16>
    %124 = vector.extract_strided_slice %48 {offsets = [0, 88], sizes = [8, 8], strides = [1, 1]} : vector<8x96xf32> to vector<8x8xf32>
    %125 = vector.shape_cast %124 : vector<8x8xf32> to vector<1x8x8xf32>
    %126 = arith.truncf %125 : vector<1x8x8xf32> to vector<1x8x8xbf16>
    "tpu.trace_start"() <{level = 10 : i32, message = "bqd,bkd->bqk"}> : () -> ()
    %cst_33 = arith.constant dense<0.000000e+00> : vector<1x8x8xf32>
    %127 = tpu.matmul %120, %123, %cst_33 {dimension_numbers = #tpu.dot_dimension_numbers<[2], [2], [1], [1], [0, 0, 0, 1, 1, 1], [0], [0]>} : vector<1x8x8xbf16>, vector<1x8x8xbf16>, vector<1x8x8xf32> -> vector<1x8x8xf32>
    "tpu.trace_stop"() : () -> ()
    %128 = arith.addf %127, %18 : vector<1x8x8xf32>
    %cst_34 = arith.constant dense<0xFF800000> : vector<1x8xf32>
    %129 = vector.multi_reduction <maximumf>, %128, %cst_34 [2] : vector<1x8x8xf32> to vector<1x8xf32>
    %130 = vector.shape_cast %129 : vector<1x8xf32> to vector<1x8x1xf32>
    %131 = vector.broadcast %130 : vector<1x8x1xf32> to vector<1x8x8xf32>
    %132 = arith.subf %128, %131 : vector<1x8x8xf32>
    %133 = math.exp %132 : vector<1x8x8xf32>
    %cst_35 = arith.constant dense<0.000000e+00> : vector<1x8xf32>
    %134 = vector.multi_reduction <add>, %133, %cst_35 [2] : vector<1x8x8xf32> to vector<1x8xf32>
    %135 = vector.shape_cast %134 : vector<1x8xf32> to vector<1x8x1xf32>
    %136 = tpu.reciprocal %135 {approx = true} : vector<1x8x1xf32> -> vector<1x8x1xf32>
    %137 = vector.broadcast %136 : vector<1x8x1xf32> to vector<1x8x8xf32>
    %138 = arith.mulf %133, %137 : vector<1x8x8xf32>
    %139 = arith.truncf %138 : vector<1x8x8xf32> to vector<1x8x8xbf16>
    "tpu.trace_start"() <{level = 10 : i32, message = "bqk,bkd->bqd"}> : () -> ()
    %cst_36 = arith.constant dense<0.000000e+00> : vector<1x8x8xf32>
    %140 = tpu.matmul %139, %126, %cst_36 {dimension_numbers = #tpu.dot_dimension_numbers<[2], [1], [1], [2], [0, 0, 0, 1, 1, 2], [0], [0]>} : vector<1x8x8xbf16>, vector<1x8x8xbf16>, vector<1x8x8xf32> -> vector<1x8x8xf32>
    "tpu.trace_stop"() : () -> ()
    %141 = tpu.concatenate %71, %94, %117, %140 in 2 : vector<1x8x8xf32>, vector<1x8x8xf32>, vector<1x8x8xf32>, vector<1x8x8xf32> -> vector<1x8x32xf32>
    %142 = vector.shape_cast %141 : vector<1x8x32xf32> to vector<8x32xf32>
    %143 = arith.truncf %142 : vector<8x32xf32> to vector<8x32xbf16>
    %cst_37 = arith.constant dense<0.000000e+00> : vector<8x32xf32>
    %144 = tpu.matmul %143, %20, %cst_37 {dimension_numbers = #tpu.dot_dimension_numbers<[1], [0], [0], [1], [0, 0, 1, 1], [], []>} : vector<8x32xbf16>, vector<32x32xbf16>, vector<8x32xf32> -> vector<8x32xf32>
    %145 = arith.addf %11, %144 : vector<8x32xf32>
    %146 = vector.broadcast %24 : vector<1x32xf32> to vector<8x32xf32>
    %147 = arith.addf %145, %146 : vector<8x32xf32>
    %cst_38 = arith.constant dense<0.000000e+00> : vector<8xf32>
    %148 = vector.multi_reduction <add>, %147, %cst_38 [1] : vector<8x32xf32> to vector<8xf32>
    %149 = vector.shape_cast %148 : vector<8xf32> to vector<8x1xf32>
    %cst_39 = arith.constant 3.200000e+01 : f32
    %150 = vector.broadcast %cst_39 : f32 to vector<8x1xf32>
    %151 = arith.divf %149, %150 : vector<8x1xf32>
    %152 = vector.broadcast %151 : vector<8x1xf32> to vector<8x32xf32>
    %153 = arith.subf %147, %152 : vector<8x32xf32>
    %154 = arith.mulf %153, %153 : vector<8x32xf32>
    %cst_40 = arith.constant dense<0.000000e+00> : vector<8xf32>
    %155 = vector.multi_reduction <add>, %154, %cst_40 [1] : vector<8x32xf32> to vector<8xf32>
    %156 = vector.shape_cast %155 : vector<8xf32> to vector<8x1xf32>
    %cst_41 = arith.constant 3.200000e+01 : f32
    %157 = vector.broadcast %cst_41 : f32 to vector<8x1xf32>
    %158 = arith.divf %156, %157 : vector<8x1xf32>
    %159 = vector.broadcast %151 : vector<8x1xf32> to vector<8x32xf32>
    %160 = arith.subf %147, %159 : vector<8x32xf32>
    %cst_42 = arith.constant 9.99999974E-6 : f32
    %161 = vector.broadcast %cst_42 : f32 to vector<8x1xf32>
    %162 = arith.addf %158, %161 : vector<8x1xf32>
    %163 = math.rsqrt %162 : vector<8x1xf32>
    %164 = vector.broadcast %163 : vector<8x1xf32> to vector<8x32xf32>
    %165 = arith.mulf %160, %164 : vector<8x32xf32>
    %166 = arith.truncf %165 : vector<8x32xf32> to vector<8x32xbf16>
    %cst_43 = arith.constant dense<0.000000e+00> : vector<8x128xf32>
    %167 = tpu.matmul %166, %21, %cst_43 {dimension_numbers = #tpu.dot_dimension_numbers<[1], [0], [0], [1], [0, 0, 1, 1], [], []>} : vector<8x32xbf16>, vector<32x128xbf16>, vector<8x128xf32> -> vector<8x128xf32>
    %168 = vector.broadcast %25 : vector<1x128xf32> to vector<8x128xf32>
    %169 = arith.addf %167, %168 : vector<8x128xf32>
    %cst_44 = arith.constant 0.000000e+00 : f32
    %170 = vector.broadcast %cst_44 : f32 to vector<8x128xf32>
    %171 = arith.maximumf %169, %170 : vector<8x128xf32>
    %172 = arith.truncf %171 : vector<8x128xf32> to vector<8x128xbf16>
    %cst_45 = arith.constant dense<0.000000e+00> : vector<8x32xf32>
    %173 = tpu.matmul %172, %22, %cst_45 {dimension_numbers = #tpu.dot_dimension_numbers<[1], [0], [0], [1], [0, 0, 1, 1], [], []>} : vector<8x128xbf16>, vector<128x32xbf16>, vector<8x32xf32> -> vector<8x32xf32>
    %174 = arith.addf %147, %173 : vector<8x32xf32>
    %175 = vector.broadcast %26 : vector<1x32xf32> to vector<8x32xf32>
    %176 = arith.addf %174, %175 : vector<8x32xf32>
    %c0_46 = arith.constant 0 : index
    %c384 = arith.constant 384 : index
    %177 = vector.load %arg3[%c0_46, %c384] : memref<32x896xbf16, #tpu.memory_space<vmem>>, vector<32x96xbf16>
    %c0_47 = arith.constant 0 : index
    %c512 = arith.constant 512 : index
    %178 = vector.load %arg3[%c0_47, %c512] : memref<32x896xbf16, #tpu.memory_space<vmem>>, vector<32x32xbf16>
    %c0_48 = arith.constant 0 : index
    %c640 = arith.constant 640 : index
    %179 = vector.load %arg3[%c0_48, %c640] : memref<32x896xbf16, #tpu.memory_space<vmem>>, vector<32x128xbf16>
    %c256_49 = arith.constant 256 : index
    %c0_50 = arith.constant 0 : index
    %180 = vector.load %arg4[%c256_49, %c0_50] : memref<384x32xbf16, #tpu.memory_space<vmem>>, vector<128x32xbf16>
    %181 = vector.extract_strided_slice %0 {offsets = [5, 0], sizes = [1, 96], strides = [1, 1]} : vector<9x128xf32> to vector<1x96xf32>
    %182 = vector.extract_strided_slice %0 {offsets = [6, 0], sizes = [1, 32], strides = [1, 1]} : vector<9x128xf32> to vector<1x32xf32>
    %183 = vector.extract_strided_slice %0 {offsets = [7, 0], sizes = [1, 128], strides = [1, 1]} : vector<9x128xf32> to vector<1x128xf32>
    %184 = vector.extract_strided_slice %0 {offsets = [8, 0], sizes = [1, 32], strides = [1, 1]} : vector<9x128xf32> to vector<1x32xf32>
    %cst_51 = arith.constant dense<0.000000e+00> : vector<8xf32>
    %185 = vector.multi_reduction <add>, %176, %cst_51 [1] : vector<8x32xf32> to vector<8xf32>
    %186 = vector.shape_cast %185 : vector<8xf32> to vector<8x1xf32>
    %cst_52 = arith.constant 3.200000e+01 : f32
    %187 = vector.broadcast %cst_52 : f32 to vector<8x1xf32>
    %188 = arith.divf %186, %187 : vector<8x1xf32>
    %189 = vector.broadcast %188 : vector<8x1xf32> to vector<8x32xf32>
    %190 = arith.subf %176, %189 : vector<8x32xf32>
    %191 = arith.mulf %190, %190 : vector<8x32xf32>
    %cst_53 = arith.constant dense<0.000000e+00> : vector<8xf32>
    %192 = vector.multi_reduction <add>, %191, %cst_53 [1] : vector<8x32xf32> to vector<8xf32>
    %193 = vector.shape_cast %192 : vector<8xf32> to vector<8x1xf32>
    %cst_54 = arith.constant 3.200000e+01 : f32
    %194 = vector.broadcast %cst_54 : f32 to vector<8x1xf32>
    %195 = arith.divf %193, %194 : vector<8x1xf32>
    %196 = vector.broadcast %188 : vector<8x1xf32> to vector<8x32xf32>
    %197 = arith.subf %176, %196 : vector<8x32xf32>
    %cst_55 = arith.constant 9.99999974E-6 : f32
    %198 = vector.broadcast %cst_55 : f32 to vector<8x1xf32>
    %199 = arith.addf %195, %198 : vector<8x1xf32>
    %200 = math.rsqrt %199 : vector<8x1xf32>
    %201 = vector.broadcast %200 : vector<8x1xf32> to vector<8x32xf32>
    %202 = arith.mulf %197, %201 : vector<8x32xf32>
    %203 = arith.truncf %202 : vector<8x32xf32> to vector<8x32xbf16>
    %cst_56 = arith.constant dense<0.000000e+00> : vector<8x96xf32>
    %204 = tpu.matmul %203, %177, %cst_56 {dimension_numbers = #tpu.dot_dimension_numbers<[1], [0], [0], [1], [0, 0, 1, 1], [], []>} : vector<8x32xbf16>, vector<32x96xbf16>, vector<8x96xf32> -> vector<8x96xf32>
    %205 = vector.broadcast %181 : vector<1x96xf32> to vector<8x96xf32>
    %206 = arith.addf %204, %205 : vector<8x96xf32>
    %207 = vector.extract_strided_slice %206 {offsets = [0, 0], sizes = [8, 8], strides = [1, 1]} : vector<8x96xf32> to vector<8x8xf32>
    %208 = vector.shape_cast %207 : vector<8x8xf32> to vector<1x8x8xf32>
    %209 = arith.truncf %208 : vector<1x8x8xf32> to vector<1x8x8xbf16>
    %210 = vector.extract_strided_slice %206 {offsets = [0, 32], sizes = [8, 8], strides = [1, 1]} : vector<8x96xf32> to vector<8x8xf32>
    %211 = vector.shape_cast %210 : vector<8x8xf32> to vector<1x8x8xf32>
    %212 = arith.truncf %211 : vector<1x8x8xf32> to vector<1x8x8xbf16>
    %213 = vector.extract_strided_slice %206 {offsets = [0, 64], sizes = [8, 8], strides = [1, 1]} : vector<8x96xf32> to vector<8x8xf32>
    %214 = vector.shape_cast %213 : vector<8x8xf32> to vector<1x8x8xf32>
    %215 = arith.truncf %214 : vector<1x8x8xf32> to vector<1x8x8xbf16>
    "tpu.trace_start"() <{level = 10 : i32, message = "bqd,bkd->bqk"}> : () -> ()
    %cst_57 = arith.constant dense<0.000000e+00> : vector<1x8x8xf32>
    %216 = tpu.matmul %209, %212, %cst_57 {dimension_numbers = #tpu.dot_dimension_numbers<[2], [2], [1], [1], [0, 0, 0, 1, 1, 1], [0], [0]>} : vector<1x8x8xbf16>, vector<1x8x8xbf16>, vector<1x8x8xf32> -> vector<1x8x8xf32>
    "tpu.trace_stop"() : () -> ()
    %217 = arith.addf %216, %18 : vector<1x8x8xf32>
    %cst_58 = arith.constant dense<0xFF800000> : vector<1x8xf32>
    %218 = vector.multi_reduction <maximumf>, %217, %cst_58 [2] : vector<1x8x8xf32> to vector<1x8xf32>
    %219 = vector.shape_cast %218 : vector<1x8xf32> to vector<1x8x1xf32>
    %220 = vector.broadcast %219 : vector<1x8x1xf32> to vector<1x8x8xf32>
    %221 = arith.subf %217, %220 : vector<1x8x8xf32>
    %222 = math.exp %221 : vector<1x8x8xf32>
    %cst_59 = arith.constant dense<0.000000e+00> : vector<1x8xf32>
    %223 = vector.multi_reduction <add>, %222, %cst_59 [2] : vector<1x8x8xf32> to vector<1x8xf32>
    %224 = vector.shape_cast %223 : vector<1x8xf32> to vector<1x8x1xf32>
    %225 = tpu.reciprocal %224 {approx = true} : vector<1x8x1xf32> -> vector<1x8x1xf32>
    %226 = vector.broadcast %225 : vector<1x8x1xf32> to vector<1x8x8xf32>
    %227 = arith.mulf %222, %226 : vector<1x8x8xf32>
    %228 = arith.truncf %227 : vector<1x8x8xf32> to vector<1x8x8xbf16>
    "tpu.trace_start"() <{level = 10 : i32, message = "bqk,bkd->bqd"}> : () -> ()
    %cst_60 = arith.constant dense<0.000000e+00> : vector<1x8x8xf32>
    %229 = tpu.matmul %228, %215, %cst_60 {dimension_numbers = #tpu.dot_dimension_numbers<[2], [1], [1], [2], [0, 0, 0, 1, 1, 2], [0], [0]>} : vector<1x8x8xbf16>, vector<1x8x8xbf16>, vector<1x8x8xf32> -> vector<1x8x8xf32>
    "tpu.trace_stop"() : () -> ()
    %230 = vector.extract_strided_slice %206 {offsets = [0, 8], sizes = [8, 8], strides = [1, 1]} : vector<8x96xf32> to vector<8x8xf32>
    %231 = vector.shape_cast %230 : vector<8x8xf32> to vector<1x8x8xf32>
    %232 = arith.truncf %231 : vector<1x8x8xf32> to vector<1x8x8xbf16>
    %233 = vector.extract_strided_slice %206 {offsets = [0, 40], sizes = [8, 8], strides = [1, 1]} : vector<8x96xf32> to vector<8x8xf32>
    %234 = vector.shape_cast %233 : vector<8x8xf32> to vector<1x8x8xf32>
    %235 = arith.truncf %234 : vector<1x8x8xf32> to vector<1x8x8xbf16>
    %236 = vector.extract_strided_slice %206 {offsets = [0, 72], sizes = [8, 8], strides = [1, 1]} : vector<8x96xf32> to vector<8x8xf32>
    %237 = vector.shape_cast %236 : vector<8x8xf32> to vector<1x8x8xf32>
    %238 = arith.truncf %237 : vector<1x8x8xf32> to vector<1x8x8xbf16>
    "tpu.trace_start"() <{level = 10 : i32, message = "bqd,bkd->bqk"}> : () -> ()
    %cst_61 = arith.constant dense<0.000000e+00> : vector<1x8x8xf32>
    %239 = tpu.matmul %232, %235, %cst_61 {dimension_numbers = #tpu.dot_dimension_numbers<[2], [2], [1], [1], [0, 0, 0, 1, 1, 1], [0], [0]>} : vector<1x8x8xbf16>, vector<1x8x8xbf16>, vector<1x8x8xf32> -> vector<1x8x8xf32>
    "tpu.trace_stop"() : () -> ()
    %240 = arith.addf %239, %18 : vector<1x8x8xf32>
    %cst_62 = arith.constant dense<0xFF800000> : vector<1x8xf32>
    %241 = vector.multi_reduction <maximumf>, %240, %cst_62 [2] : vector<1x8x8xf32> to vector<1x8xf32>
    %242 = vector.shape_cast %241 : vector<1x8xf32> to vector<1x8x1xf32>
    %243 = vector.broadcast %242 : vector<1x8x1xf32> to vector<1x8x8xf32>
    %244 = arith.subf %240, %243 : vector<1x8x8xf32>
    %245 = math.exp %244 : vector<1x8x8xf32>
    %cst_63 = arith.constant dense<0.000000e+00> : vector<1x8xf32>
    %246 = vector.multi_reduction <add>, %245, %cst_63 [2] : vector<1x8x8xf32> to vector<1x8xf32>
    %247 = vector.shape_cast %246 : vector<1x8xf32> to vector<1x8x1xf32>
    %248 = tpu.reciprocal %247 {approx = true} : vector<1x8x1xf32> -> vector<1x8x1xf32>
    %249 = vector.broadcast %248 : vector<1x8x1xf32> to vector<1x8x8xf32>
    %250 = arith.mulf %245, %249 : vector<1x8x8xf32>
    %251 = arith.truncf %250 : vector<1x8x8xf32> to vector<1x8x8xbf16>
    "tpu.trace_start"() <{level = 10 : i32, message = "bqk,bkd->bqd"}> : () -> ()
    %cst_64 = arith.constant dense<0.000000e+00> : vector<1x8x8xf32>
    %252 = tpu.matmul %251, %238, %cst_64 {dimension_numbers = #tpu.dot_dimension_numbers<[2], [1], [1], [2], [0, 0, 0, 1, 1, 2], [0], [0]>} : vector<1x8x8xbf16>, vector<1x8x8xbf16>, vector<1x8x8xf32> -> vector<1x8x8xf32>
    "tpu.trace_stop"() : () -> ()
    %253 = vector.extract_strided_slice %206 {offsets = [0, 16], sizes = [8, 8], strides = [1, 1]} : vector<8x96xf32> to vector<8x8xf32>
    %254 = vector.shape_cast %253 : vector<8x8xf32> to vector<1x8x8xf32>
    %255 = arith.truncf %254 : vector<1x8x8xf32> to vector<1x8x8xbf16>
    %256 = vector.extract_strided_slice %206 {offsets = [0, 48], sizes = [8, 8], strides = [1, 1]} : vector<8x96xf32> to vector<8x8xf32>
    %257 = vector.shape_cast %256 : vector<8x8xf32> to vector<1x8x8xf32>
    %258 = arith.truncf %257 : vector<1x8x8xf32> to vector<1x8x8xbf16>
    %259 = vector.extract_strided_slice %206 {offsets = [0, 80], sizes = [8, 8], strides = [1, 1]} : vector<8x96xf32> to vector<8x8xf32>
    %260 = vector.shape_cast %259 : vector<8x8xf32> to vector<1x8x8xf32>
    %261 = arith.truncf %260 : vector<1x8x8xf32> to vector<1x8x8xbf16>
    "tpu.trace_start"() <{level = 10 : i32, message = "bqd,bkd->bqk"}> : () -> ()
    %cst_65 = arith.constant dense<0.000000e+00> : vector<1x8x8xf32>
    %262 = tpu.matmul %255, %258, %cst_65 {dimension_numbers = #tpu.dot_dimension_numbers<[2], [2], [1], [1], [0, 0, 0, 1, 1, 1], [0], [0]>} : vector<1x8x8xbf16>, vector<1x8x8xbf16>, vector<1x8x8xf32> -> vector<1x8x8xf32>
    "tpu.trace_stop"() : () -> ()
    %263 = arith.addf %262, %18 : vector<1x8x8xf32>
    %cst_66 = arith.constant dense<0xFF800000> : vector<1x8xf32>
    %264 = vector.multi_reduction <maximumf>, %263, %cst_66 [2] : vector<1x8x8xf32> to vector<1x8xf32>
    %265 = vector.shape_cast %264 : vector<1x8xf32> to vector<1x8x1xf32>
    %266 = vector.broadcast %265 : vector<1x8x1xf32> to vector<1x8x8xf32>
    %267 = arith.subf %263, %266 : vector<1x8x8xf32>
    %268 = math.exp %267 : vector<1x8x8xf32>
    %cst_67 = arith.constant dense<0.000000e+00> : vector<1x8xf32>
    %269 = vector.multi_reduction <add>, %268, %cst_67 [2] : vector<1x8x8xf32> to vector<1x8xf32>
    %270 = vector.shape_cast %269 : vector<1x8xf32> to vector<1x8x1xf32>
    %271 = tpu.reciprocal %270 {approx = true} : vector<1x8x1xf32> -> vector<1x8x1xf32>
    %272 = vector.broadcast %271 : vector<1x8x1xf32> to vector<1x8x8xf32>
    %273 = arith.mulf %268, %272 : vector<1x8x8xf32>
    %274 = arith.truncf %273 : vector<1x8x8xf32> to vector<1x8x8xbf16>
    "tpu.trace_start"() <{level = 10 : i32, message = "bqk,bkd->bqd"}> : () -> ()
    %cst_68 = arith.constant dense<0.000000e+00> : vector<1x8x8xf32>
    %275 = tpu.matmul %274, %261, %cst_68 {dimension_numbers = #tpu.dot_dimension_numbers<[2], [1], [1], [2], [0, 0, 0, 1, 1, 2], [0], [0]>} : vector<1x8x8xbf16>, vector<1x8x8xbf16>, vector<1x8x8xf32> -> vector<1x8x8xf32>
    "tpu.trace_stop"() : () -> ()
    %276 = vector.extract_strided_slice %206 {offsets = [0, 24], sizes = [8, 8], strides = [1, 1]} : vector<8x96xf32> to vector<8x8xf32>
    %277 = vector.shape_cast %276 : vector<8x8xf32> to vector<1x8x8xf32>
    %278 = arith.truncf %277 : vector<1x8x8xf32> to vector<1x8x8xbf16>
    %279 = vector.extract_strided_slice %206 {offsets = [0, 56], sizes = [8, 8], strides = [1, 1]} : vector<8x96xf32> to vector<8x8xf32>
    %280 = vector.shape_cast %279 : vector<8x8xf32> to vector<1x8x8xf32>
    %281 = arith.truncf %280 : vector<1x8x8xf32> to vector<1x8x8xbf16>
    %282 = vector.extract_strided_slice %206 {offsets = [0, 88], sizes = [8, 8], strides = [1, 1]} : vector<8x96xf32> to vector<8x8xf32>
    %283 = vector.shape_cast %282 : vector<8x8xf32> to vector<1x8x8xf32>
    %284 = arith.truncf %283 : vector<1x8x8xf32> to vector<1x8x8xbf16>
    "tpu.trace_start"() <{level = 10 : i32, message = "bqd,bkd->bqk"}> : () -> ()
    %cst_69 = arith.constant dense<0.000000e+00> : vector<1x8x8xf32>
    %285 = tpu.matmul %278, %281, %cst_69 {dimension_numbers = #tpu.dot_dimension_numbers<[2], [2], [1], [1], [0, 0, 0, 1, 1, 1], [0], [0]>} : vector<1x8x8xbf16>, vector<1x8x8xbf16>, vector<1x8x8xf32> -> vector<1x8x8xf32>
    "tpu.trace_stop"() : () -> ()
    %286 = arith.addf %285, %18 : vector<1x8x8xf32>
    %cst_70 = arith.constant dense<0xFF800000> : vector<1x8xf32>
    %287 = vector.multi_reduction <maximumf>, %286, %cst_70 [2] : vector<1x8x8xf32> to vector<1x8xf32>
    %288 = vector.shape_cast %287 : vector<1x8xf32> to vector<1x8x1xf32>
    %289 = vector.broadcast %288 : vector<1x8x1xf32> to vector<1x8x8xf32>
    %290 = arith.subf %286, %289 : vector<1x8x8xf32>
    %291 = math.exp %290 : vector<1x8x8xf32>
    %cst_71 = arith.constant dense<0.000000e+00> : vector<1x8xf32>
    %292 = vector.multi_reduction <add>, %291, %cst_71 [2] : vector<1x8x8xf32> to vector<1x8xf32>
    %293 = vector.shape_cast %292 : vector<1x8xf32> to vector<1x8x1xf32>
    %294 = tpu.reciprocal %293 {approx = true} : vector<1x8x1xf32> -> vector<1x8x1xf32>
    %295 = vector.broadcast %294 : vector<1x8x1xf32> to vector<1x8x8xf32>
    %296 = arith.mulf %291, %295 : vector<1x8x8xf32>
    %297 = arith.truncf %296 : vector<1x8x8xf32> to vector<1x8x8xbf16>
    "tpu.trace_start"() <{level = 10 : i32, message = "bqk,bkd->bqd"}> : () -> ()
    %cst_72 = arith.constant dense<0.000000e+00> : vector<1x8x8xf32>
    %298 = tpu.matmul %297, %284, %cst_72 {dimension_numbers = #tpu.dot_dimension_numbers<[2], [1], [1], [2], [0, 0, 0, 1, 1, 2], [0], [0]>} : vector<1x8x8xbf16>, vector<1x8x8xbf16>, vector<1x8x8xf32> -> vector<1x8x8xf32>
    "tpu.trace_stop"() : () -> ()
    %299 = tpu.concatenate %229, %252, %275, %298 in 2 : vector<1x8x8xf32>, vector<1x8x8xf32>, vector<1x8x8xf32>, vector<1x8x8xf32> -> vector<1x8x32xf32>
    %300 = vector.shape_cast %299 : vector<1x8x32xf32> to vector<8x32xf32>
    %301 = arith.truncf %300 : vector<8x32xf32> to vector<8x32xbf16>
    %cst_73 = arith.constant dense<0.000000e+00> : vector<8x32xf32>
    %302 = tpu.matmul %301, %178, %cst_73 {dimension_numbers = #tpu.dot_dimension_numbers<[1], [0], [0], [1], [0, 0, 1, 1], [], []>} : vector<8x32xbf16>, vector<32x32xbf16>, vector<8x32xf32> -> vector<8x32xf32>
    %303 = arith.addf %176, %302 : vector<8x32xf32>
    %304 = vector.broadcast %182 : vector<1x32xf32> to vector<8x32xf32>
    %305 = arith.addf %303, %304 : vector<8x32xf32>
    %cst_74 = arith.constant dense<0.000000e+00> : vector<8xf32>
    %306 = vector.multi_reduction <add>, %305, %cst_74 [1] : vector<8x32xf32> to vector<8xf32>
    %307 = vector.shape_cast %306 : vector<8xf32> to vector<8x1xf32>
    %cst_75 = arith.constant 3.200000e+01 : f32
    %308 = vector.broadcast %cst_75 : f32 to vector<8x1xf32>
    %309 = arith.divf %307, %308 : vector<8x1xf32>
    %310 = vector.broadcast %309 : vector<8x1xf32> to vector<8x32xf32>
    %311 = arith.subf %305, %310 : vector<8x32xf32>
    %312 = arith.mulf %311, %311 : vector<8x32xf32>
    %cst_76 = arith.constant dense<0.000000e+00> : vector<8xf32>
    %313 = vector.multi_reduction <add>, %312, %cst_76 [1] : vector<8x32xf32> to vector<8xf32>
    %314 = vector.shape_cast %313 : vector<8xf32> to vector<8x1xf32>
    %cst_77 = arith.constant 3.200000e+01 : f32
    %315 = vector.broadcast %cst_77 : f32 to vector<8x1xf32>
    %316 = arith.divf %314, %315 : vector<8x1xf32>
    %317 = vector.broadcast %309 : vector<8x1xf32> to vector<8x32xf32>
    %318 = arith.subf %305, %317 : vector<8x32xf32>
    %cst_78 = arith.constant 9.99999974E-6 : f32
    %319 = vector.broadcast %cst_78 : f32 to vector<8x1xf32>
    %320 = arith.addf %316, %319 : vector<8x1xf32>
    %321 = math.rsqrt %320 : vector<8x1xf32>
    %322 = vector.broadcast %321 : vector<8x1xf32> to vector<8x32xf32>
    %323 = arith.mulf %318, %322 : vector<8x32xf32>
    %324 = arith.truncf %323 : vector<8x32xf32> to vector<8x32xbf16>
    %cst_79 = arith.constant dense<0.000000e+00> : vector<8x128xf32>
    %325 = tpu.matmul %324, %179, %cst_79 {dimension_numbers = #tpu.dot_dimension_numbers<[1], [0], [0], [1], [0, 0, 1, 1], [], []>} : vector<8x32xbf16>, vector<32x128xbf16>, vector<8x128xf32> -> vector<8x128xf32>
    %326 = vector.broadcast %183 : vector<1x128xf32> to vector<8x128xf32>
    %327 = arith.addf %325, %326 : vector<8x128xf32>
    %cst_80 = arith.constant 0.000000e+00 : f32
    %328 = vector.broadcast %cst_80 : f32 to vector<8x128xf32>
    %329 = arith.maximumf %327, %328 : vector<8x128xf32>
    %330 = arith.truncf %329 : vector<8x128xf32> to vector<8x128xbf16>
    %cst_81 = arith.constant dense<0.000000e+00> : vector<8x32xf32>
    %331 = tpu.matmul %330, %180, %cst_81 {dimension_numbers = #tpu.dot_dimension_numbers<[1], [0], [0], [1], [0, 0, 1, 1], [], []>} : vector<8x128xbf16>, vector<128x32xbf16>, vector<8x32xf32> -> vector<8x32xf32>
    %332 = arith.addf %305, %331 : vector<8x32xf32>
    %333 = vector.broadcast %184 : vector<1x32xf32> to vector<8x32xf32>
    %334 = arith.addf %332, %333 : vector<8x32xf32>
    %cst_82 = arith.constant dense<0.000000e+00> : vector<8xf32>
    %335 = vector.multi_reduction <add>, %334, %cst_82 [1] : vector<8x32xf32> to vector<8xf32>
    %336 = vector.shape_cast %335 : vector<8xf32> to vector<8x1xf32>
    %cst_83 = arith.constant 3.200000e+01 : f32
    %337 = vector.broadcast %cst_83 : f32 to vector<8x1xf32>
    %338 = arith.divf %336, %337 : vector<8x1xf32>
    %339 = vector.broadcast %338 : vector<8x1xf32> to vector<8x32xf32>
    %340 = arith.subf %334, %339 : vector<8x32xf32>
    %341 = arith.mulf %340, %340 : vector<8x32xf32>
    %cst_84 = arith.constant dense<0.000000e+00> : vector<8xf32>
    %342 = vector.multi_reduction <add>, %341, %cst_84 [1] : vector<8x32xf32> to vector<8xf32>
    %343 = vector.shape_cast %342 : vector<8xf32> to vector<8x1xf32>
    %cst_85 = arith.constant 3.200000e+01 : f32
    %344 = vector.broadcast %cst_85 : f32 to vector<8x1xf32>
    %345 = arith.divf %343, %344 : vector<8x1xf32>
    %346 = vector.broadcast %338 : vector<8x1xf32> to vector<8x32xf32>
    %347 = arith.subf %334, %346 : vector<8x32xf32>
    %cst_86 = arith.constant 9.99999974E-6 : f32
    %348 = vector.broadcast %cst_86 : f32 to vector<8x1xf32>
    %349 = arith.addf %345, %348 : vector<8x1xf32>
    %350 = math.rsqrt %349 : vector<8x1xf32>
    %351 = vector.broadcast %350 : vector<8x1xf32> to vector<8x32xf32>
    %352 = arith.mulf %347, %351 : vector<8x32xf32>
    %353 = arith.truncf %352 : vector<8x32xf32> to vector<8x32xbf16>
    %c0_87 = arith.constant 0 : index
    %c768 = arith.constant 768 : index
    %354 = vector.load %arg3[%c0_87, %c768] : memref<32x896xbf16, #tpu.memory_space<vmem>>, vector<32x128xbf16>
    %355 = vector.extract_strided_slice %0 {offsets = [0, 0], sizes = [1, 128], strides = [1, 1]} : vector<9x128xf32> to vector<1x128xf32>
    %cst_88 = arith.constant dense<0.000000e+00> : vector<8x128xf32>
    %356 = tpu.matmul %353, %354, %cst_88 {dimension_numbers = #tpu.dot_dimension_numbers<[1], [0], [0], [1], [0, 0, 1, 1], [], []>} : vector<8x32xbf16>, vector<32x128xbf16>, vector<8x128xf32> -> vector<8x128xf32>
    %357 = vector.broadcast %355 : vector<1x128xf32> to vector<8x128xf32>
    %358 = arith.addf %356, %357 : vector<8x128xf32>
    %c0_89 = arith.constant 0 : index
    %c0_90 = arith.constant 0 : index
    %359 = vector.load %arg6[%c0_89, %c0_90] : memref<8x128xf32, #tpu.memory_space<vmem>>, vector<8x128xf32>
    tpu.vector_store %arg6[%c0_89, %c0_90], %358 {strides = array<i32>} : memref<8x128xf32, #tpu.memory_space<vmem>>, vector<8x128xf32>,
    return
  }
  func.func @transform_0(%arg0: i32) -> (i32, i32) {
    %c0_i32 = arith.constant 0 : i32
    %c0_i32_0 = arith.constant 0 : i32
    return %arg0, %c0_i32 : i32, i32
  }
  func.func @transform_1(%arg0: i32) -> (i32, i32) {
    %c0_i32 = arith.constant 0 : i32
    %c0_i32_0 = arith.constant 0 : i32
    return %arg0, %c0_i32 : i32, i32
  }
  func.func @transform_2(%arg0: i32) -> (i32, i32) {
    %c0_i32 = arith.constant 0 : i32
    %c0_i32_0 = arith.constant 0 : i32
    %c0_i32_1 = arith.constant 0 : i32
    return %c0_i32, %c0_i32_0 : i32, i32
  }
  func.func @transform_3(%arg0: i32) -> (i32, i32) {
    %c0_i32 = arith.constant 0 : i32
    %c0_i32_0 = arith.constant 0 : i32
    %c0_i32_1 = arith.constant 0 : i32
    return %c0_i32, %c0_i32_0 : i32, i32
  }
  func.func @transform_4(%arg0: i32) -> (i32, i32) {
    %c0_i32 = arith.constant 0 : i32
    %c0_i32_0 = arith.constant 0 : i32
    %c0_i32_1 = arith.constant 0 : i32
    return %c0_i32, %c0_i32_0 : i32, i32
  }
  func.func @transform_5(%arg0: i32) -> (i32, i32) {
    %c0_i32 = arith.constant 0 : i32
    %c0_i32_0 = arith.constant 0 : i32
    return %arg0, %c0_i32 : i32, i32
  }
}

</mosaic_0001>

<bundles_post_ra>
// kernel: tpu_custom_call.1
= control target key start
LH: loop header
LB: loop body
LE: loop exit
PB: predicated region body
PF: predicated region fallthrough
CT: control target
= control target key end

     0   :  { %10 = vsyncpa [#allocation3], 0  ;;  %s3237_s0 = inlined_call_operand.vmem [shape: s32[16,1], index: 0, kind: input, shape index: {}]   ;;  %s3238_s1 = inlined_call_operand.vmem [shape: f32[16,32], index: 1, kind: input, shape index: {}]   ;;  %s3239_s2 = inlined_call_operand.vmem [shape: bf16[32,896], index: 2, kind: input, shape index: {}]   ;;  %s3240_s3 = inlined_call_operand.vmem [shape: bf16[384,32], index: 3, kind: input, shape index: {}]   ;;  %s3241_s4 = inlined_call_operand.vmem [shape: f32[9,128], index: 4, kind: input, shape index: {}]   ;;  %s3242_s5 = inlined_call_operand.hbm [shape: f32[16,128], index: 5, kind: output, shape index: {}]  }
   0x1   :  { %12 = vsyncpa [#allocation3 + $0x1], 0  ;;  %s2722_s18 = smov 0   ;;  %s2724_s19 = smov 0  }
   0x2   :  { %s2726_s20 = smov 0   ;;  %s2728_s21 = smov 0  }
   0x3 LB: > { %s2743_s22 = sadd.s32 4294967295, %s2670_s21   ;;  %s2102_s23 = sadd.s32 4294967294, %s2670_s21   ;;  %s2670_s21 = sphi %s2728_s21, %s3260_s21   ;;  %s2666_s20 = sphi %s2726_s20, %s3259_s20   ;;  %s2662_s19 = sphi %s2724_s19, %s3258_s19   ;;  %s2658_s18 = sphi %s2722_s18, %s3257_s18  }
   0x4   : > { %s2747_s24 = sadd.s32 1, %s2670_s21   ;;  %s140_s25 = sadd.s32 1, %s2666_s20 }
   0x5   : > { %s137_s26 = ssub.s32 %s2670_s21, %s2747_s24  ;;  %p150_p0 = scmp.ne.s32.totalorder %s2666_s20, %s2662_s19 }
   0x6   : > { %p138_p1 = scmp.eq.s32.totalorder %s137_s26, 0  ;;  %p151_p2 = scmp.eq.s32.totalorder %s2743_s22, 1 }
   0x7   : > { %p156_p3 = scmp.ne.s32.totalorder %s2662_s19, %s2658_s18  ;;  %p157_p4 = scmp.eq.s32.totalorder %s2102_s23, 1 }
   0x8   : > { %s2758_s27 = scalar_select %p138_p1, %s2666_s20, %s140_s25  }
   0x9   : > { %p2760_p5 = por %p151_p2, %p150_p0  ;;  %p2764_p6 = por %p157_p4, %p156_p3 }
   0xa   : > { %p2105_p7 = scmp.ge.s32.totalorder %s2670_s21, 1  ;;  %p198_p8 = scmp.lt.s32.totalorder %s2670_s21, 3 }
   0xc   : > { %p199_p9 = pnand %p2105_p7, %p198_p8 }
   0xd   : > { %p229_p10 = scmp.lt.s32.totalorder (!%p199_p9), %s2743_s22, 1  ;;  %s2676_s25 = smov (!%p199_p9), 96  }
   0xe   : > { %202 = sbr.rel (%p199_p9) target bundleno = 7125 (0x1bd5), region = 40  ;;  %s2678_s26 = smov (!%p199_p9), 88  }
   0xf   : > { %s2679_s30 = smov (!%p199_p9), 64   ;;  %s2680_s6 = smov (!%p199_p9), 120  }
  0x10   : > { %s3248_s8 = smov (!%p199_p9), 56   ;;  %s2682_s9 = smov (!%p199_p9), 112  }
  0x11   : > { %s2683_s11 = smov (!%p199_p9), 72   ;;  %s2684_s12 = smov (!%p199_p9), 104  }
  0x12   : > { %s3244_s15 = smov (!%p199_p9), 24   ;;  %s3255_s16 = smov (!%p199_p9), 16  }
  0x13   : > { %v2529_v0 = vld [vmem:[%s3240_s3 + $0x38] sm:$0xff]   ;;  %v2672_v1 = vmov 0   ;;  %v2673_v2 = vmov 0.0   ;;  %s2776_s7 = scalar_select %p229_p10, %s2743_s22, 1  ;;  %v2530_v3 = vld [vmem:[%s3240_s3 + $0x30] sm:$0xff]   ;;  %v2531_v5 = vld [vmem:[%s3240_s3 + $0x28] sm:$0xff]   ;;  %v241_v11 = vlaneseq }
  0x14   : > { %2528 = vset.pattern.permute.xlu0 %v2672_v1  ;;  %2258 = vmatprep.subr.bf16.mxu0 %v2673_v2  ;;  %vm2674_vm0 = vmmov 0   ;;  %v2532_v6 = vld [vmem:[%s3240_s3 + $0x20] sm:$0xff]   ;;  %v2533_v7 = vld [vmem:[%s3240_s3 + $0x18] sm:$0xff]   ;;  %v2534_v8 = vld [vmem:[%s3240_s3 + $0x10] sm:$0xff]   ;;  %v2675_v14 = vmov 1.0|1.0  }
  0x15   : > { %2259 = vmatpush3.bf16.msra.mxu0 %v2529_v0  ;;  %2278 = vmatprep.subr.bf16.mxu1 %v2673_v2  ;;  %s2107_s10 = sshll.u32 %s2776_s7, 3  ;;  %v2535_v9 = vld [vmem:[%s3240_s3 + $0x8] sm:$0xff]   ;;  %v2536_v10 = vld [vmem:[%s3240_s3] sm:$0xff]   ;;  %v242_v12 = vand.u32 127, %v241_v11  ;;  %vm387_vm3 = vcmask 261120   ;;  %v2842_v35 = vshrl.u32 %v241_v11, 7 }
  0x16   : > { %2260 = vmatprep.subr.bf16.mxu0 %v2673_v2  ;;  %s232_s13 = scalar_lea.vmem %s3237_s0, %s2107_s10  ;;  %2274 = vmatprep.mubr.msk.bf16.mxu0 %vm2674_vm0, %v2673_v2  ;;  %s236_s14 = scalar_lea.vmem %s3238_s1, %s2107_s10  ;;  %v2537_v27 = vld [vmem:[%s3239_s2 + $0x38] ss:$28 sps:$4 sm:$0xff]   ;;  %v2538_v28 = vld [vmem:[%s3239_s2] ss:$28 sps:$4 sm:$0xff]   ;;  %vm466_vm4 = vcmask 64512   ;;  %vm530_vm6 = vcmask 1043456  }
  0x17   : > { %v240_v4 = vld [vmem:[%s232_s13] sm:$0xff]  ;;  %2282 = vmatprep.mubr.msk.bf16.mxu1 %vm2674_vm0, %v2673_v2  ;;  %2279 = vmatpush3.bf16.msra.mxu1 %v2537_v27  ;;  %v405_v36 = vsub.s32 1, %v2842_v35  ;;  %vm357_vm5 = vcmp.ge.s32.totalorder %v2842_v35, %v242_v12  ;;  %v2677_v47 = vmov -1e+30   ;;  %s2685_s13 = smov 80   ;;  %s3247_s7 = smov 40  }
  0x18   : > { %244 = vperm.xlu0 %2528, %v240_v4   ;;  %v266_v15 = vld [vmem:[%s236_s14] sm:$0xff]  ;;  %2280 = vmatprep.subr.bf16.mxu1 %v2673_v2  ;;  %v2862_v48 = vsel %vm357_vm5, 0.0, %v2677_v47  ;;  %s3246_s14 = smov 48   ;;  %s3243_s10 = smov 8   ;;  %vm917_vm7 = vcmask 130048   ;;  %vm919_vm8 = vcmask 195584  }
  0x19   : > { %2261 = vmatpush3.bf16.msra.mxu0 %v2530_v3  ;;  %v2848_v37 = vld [vmem:[%s3241_s4] sm:$0xff] }
  0x1a   : > { %2262 = vmatprep.subr.bf16.mxu0 %v2673_v2  ;;  %v406_v38 = vrot.slane %v2848_v37, %v405_v36 }
  0x1b   : > { %2281 = vmatpush3.bf16.msra.mxu1 %v2538_v28 }
  0x1c   : > { %2286 = vmatprep.subr.bf16.mxu1 %v2673_v2 }
  0x1d   : > { %2263 = vmatpush3.bf16.msra.mxu0 %v2531_v5 }
  0x1e   : > { %2264 = vmatprep.subr.bf16.mxu0 %v2673_v2 }
  0x21   : > { %2265 = vmatpush3.bf16.msra.mxu0 %v2532_v6 }
  0x22   : > { %2266 = vmatprep.subr.bf16.mxu0 %v2673_v2 }
  0x25   : > { %2267 = vmatpush3.bf16.msra.mxu0 %v2533_v7 }
  0x26   : > { %2268 = vmatprep.subr.bf16.mxu0 %v2673_v2 }
  0x29   : > { %2269 = vmatpush3.bf16.msra.mxu0 %v2534_v8 }
  0x2a   : > { %2270 = vmatprep.subr.bf16.mxu0 %v2673_v2 }
  0x2d   : > { %2271 = vmatpush3.bf16.msra.mxu0 %v2535_v9 }
  0x2e   : > { %2272 = vmatprep.subr.bf16.mxu0 %v2673_v2 }
  0x31   : > { %2273 = vmatpush3.bf16.msra.mxu0 %v2536_v10 }
  0x32   : > { %2316 = vmatprep.subr.bf16.mxu0 %v2673_v2 }
  0x93   : > { %v245_v13 = vpop.permute.xlu0 %244 }
  0x94   : > { %vm246_vm1 = vcmp.eq.s32.totalorder %v242_v12, %v245_v13 }
  0x95   : > { %vm2118_vm2 = vmpackc.low %vm246_vm1, %vm246_vm1 }
  0x96   : > { %2275 = vmatmul.mubr.msk.bf16.vlgmr.msra.gmra.mxu0 %vm2118_vm2, %v2675_v14 }
  0x97   : > { %2318 = vmatprep.mubr.msk.bf16.mxu0 %vm2674_vm0, %v2673_v2 }
 0x156   : > { %v349_v16 = vpop.f32.mrf.mxu0 }
 0x157   : > { %v2825_v17 = vadd.f32 %v349_v16, %v266_v15 }
 0x158   : > { %v2276_v18 = vpop.f32.mrf.mxu0 }
 0x159   : > { %v388_v19 = vsel %vm387_vm3, %v2825_v17, 0.0 }
 0x15a   : > { %389 = vadd.xlane.f32.xlu0 %v388_v19  ;;  %v352_v20 = vpop.f32.mrf.mxu0 }
 0x15c   : > { %v2277_v21 = vpop.f32.mrf.mxu0 }
 0x1e3   : > { %v390_v22 = vpop.xlane.xlu0 %389 }
 0x1e4   : > { %v392_v23 = vmul.f32 0.03125, %v390_v22 }
 0x1e6   : > { %v393_v24 = vsub.f32 %v2825_v17, %v392_v23 }
 0x1e8   : > { %v394_v25 = vmul.f32 %v393_v24, %v393_v24 }
 0x1ea   : > { %v395_v26 = vsel %vm387_vm3, %v394_v25, 0.0 }
 0x1eb   : > { %396 = vadd.xlane.f32.xlu1 %v395_v26 }
 0x274   : > { %v397_v29 = vpop.xlane.xlu1 %396 }
 0x275   : > { %v398_v30 = vmul.f32 0.03125, %v397_v29 }
 0x277   : > { %v399_v31 = vadd.f32 1e-05, %v398_v30 }
 0x279   : > { %2567 = vrsqrt.f32 %v399_v31 }
 0x286   : > { %v2568_v32 = vpop.eup %2567 }
 0x287   : > { %v401_v33 = vmul.f32 %v2568_v32, %v393_v24 }
 0x289   : > { %v402_v34 = vpack.c.bf16 %v401_v33, %v401_v33 }
 0x28b   : > { %2283 = vmatmul.mubr.msk.bf16.vlgmr.msra.gmra.mxu1 %vm387_vm3, %v402_v34 }
 0x28c   : > { %2288 = vmatprep.mubr.msk.bf16.mxu1 %vm2674_vm0, %v2673_v2 }
 0x34b   : > { %v456_v39 = vpop.f32.mrf.mxu1 }
 0x34c   : > { %v457_v40 = vadd.f32 %v456_v39, %v406_v38 }
 0x34d   : > { %v2284_v41 = vpop.f32.mrf.mxu1 }
 0x34e   : > { %v2851_v42 = vpack.c.bf16 %v457_v40, %v457_v40 }
 0x34f   : > { %v459_v43 = vpop.f32.mrf.mxu1 }
 0x350   : > { %464 = vrot.lane.b32.xlu1 %v2851_v42, %s2676_s25 }
 0x351   : > { %v2285_v44 = vpop.f32.mrf.mxu1 }
 0x3c2   : > { %v465_v45 = vpop.permute.xlu1 %464 }
 0x3c3   : > { %v471_v46 = vsel %vm466_vm4, %v465_v45, 0 }
 0x3c4   : > { %2287 = vmatpush3.bf16.xpose.msra.mxu1 %v471_v46 }
 0x3c5   : > { %2292 = vmatprep.subr.bf16.mxu1 %v2673_v2 }
 0x3cb   : > { %2289 = vmatmul.mubr.msk.bf16.vlgmr.msra.gmra.mxu1 %vm466_vm4, %v2851_v42 }
 0x3cc   : > { %2294 = vmatprep.mubr.msk.bf16.mxu1 %vm2674_vm0, %v2673_v2 }
 0x48b   : > { %v507_v49 = vpop.f32.mrf.mxu1 }
 0x48c   : > { %v508_v50 = vadd.f32 %v507_v49, %v2862_v48 }
 0x48d   : > { %v2290_v51 = vpop.f32.mrf.mxu1 }
 0x48e   : > { %v513_v52 = vsel %vm466_vm4, %v508_v50, -inf }
 0x48f   : > { %514 = vmax.xlane.f32.xlu1 %v513_v52  ;;  %v510_v53 = vpop.f32.mrf.mxu1 }
 0x491   : > { %v2291_v54 = vpop.f32.mrf.mxu1 }
 0x4a0   : > { %576 = vrot.lane.b32.xlu1 %v2851_v42, %s2678_s26 }
 0x518   : > { %v515_v55 = vpop.xlane.xlu1 %514 }
 0x519   : > { %v516_v56 = vsub.f32 %v508_v50, %v515_v55 }
 0x51b   : > { %v517_v57 = vmul.f32 1.442695, %v516_v56 }
 0x51c   : > { %v577_v1 = vpop.permute.xlu1 %576 }
 0x51d   : > { %2569 = vpow2.f32 %v517_v57  ;;  %v582_v4 = vsel %vm466_vm4, %v577_v1, 0 }
 0x52a   : > { %v2570_v58 = vpop.eup %2569 }
 0x52b   : > { %v519_v59 = vsel %vm466_vm4, %v2570_v58, 0.0 }
 0x52c   : > { %520 = vadd.xlane.f32.xlu0 %v519_v59 }
 0x542   : > { %525 = vrot.lane.b32.xlu0 %v2851_v42, %s2679_s30 }
 0x546   : > { %574 = vrot.lane.b32.xlu0 %v2851_v42, %s2680_s6 }
 0x5b5   : > { %v521_v60 = vpop.xlane.xlu0 %520 }
 0x5b6   : > { %2571 = vrcp.f32 %v521_v60 }
 0x5b9   : > { %v526_v61 = vpop.permute.xlu0 %525 }
 0x5ba   : > { %v532_v62 = vsel %vm530_vm6, %v526_v61, 0 }
 0x5bb   : > { %2293 = vmatpush3.bf16.msra.mxu1 %v532_v62 }
 0x5bc   : > { %2298 = vmatprep.subr.bf16.mxu1 %v2673_v2 }
 0x5bd   : > { %v575_v5 = vpop.permute.xlu0 %574 }
 0x5c3   : > { %v2572_v63 = vpop.eup %2571 }
 0x5c4   : > { %v523_v0 = vmul.f32 %v2572_v63, %v2570_v58 }
 0x5c6   : > { %v524_v3 = vpack.c.bf16 %v523_v0, %v523_v0 }
 0x5c8   : > { %2295 = vmatmul.mubr.msk.bf16.vlgmr.msra.gmra.mxu1 %vm466_vm4, %v524_v3 }
 0x5c9   : > { %2299 = vmatpush3.bf16.xpose.msra.mxu1 %v582_v4  ;;  %2300 = vmatprep.mubr.msk.bf16.mxu1 %vm2674_vm0, %v2673_v2 }
 0x5ca   : > { %2304 = vmatprep.subr.bf16.mxu1 %v2673_v2 }
 0x5d0   : > { %2301 = vmatmul.mubr.msk.bf16.vlgmr.msra.gmra.mxu1 %vm466_vm4, %v575_v5 }
 0x5d1   : > { %2306 = vmatprep.mubr.msk.bf16.mxu1 %vm2674_vm0, %v2673_v2 }
 0x688   : > { %v2883_v6 = vpop.f32.mrf.mxu1 }
 0x68a   : > { %v2296_v7 = vpop.f32.mrf.mxu1 }
 0x68c   : > { %v571_v8 = vpop.f32.mrf.mxu1 }
 0x68e   : > { %v2297_v9 = vpop.f32.mrf.mxu1 }
 0x690   : > { %v618_v10 = vpop.f32.mrf.mxu1 }
 0x691   : > { %v619_v11 = vadd.f32 %v618_v10, %v2862_v48 }
 0x692   : > { %v2302_v12 = vpop.f32.mrf.mxu1 }
 0x693   : > { %v624_v13 = vsel %vm466_vm4, %v619_v11, -inf }
 0x694   : > { %625 = vmax.xlane.f32.xlu0 %v624_v13  ;;  %v621_v14 = vpop.f32.mrf.mxu1  ;;  %v2539_v13 = vld [vmem:[%s3239_s2 + $0x3c] ss:$28 sps:$4 sm:$0xff]  }
 0x695   : > { %v2540_v14 = vld [vmem:[%s3239_s2 + $0x4] ss:$28 sps:$4 sm:$0xff]  }
 0x696   : > { %v2303_v15 = vpop.f32.mrf.mxu1 }
 0x6aa   : > { %636 = vrot.lane.b32.xlu0 %v2851_v42, %s3248_s8 }
 0x6ae   : > { %684 = vrot.lane.b32.xlu0 %v2851_v42, %s2682_s9 }
 0x6b2   : > { %796 = vrot.lane.b32.xlu0 %v2851_v42, %s2683_s11 }
 0x6b6   : > { %794 = vrot.lane.b32.xlu0 %v2851_v42, %s2684_s12 }
 0x71d   : > { %v626_v16 = vpop.xlane.xlu0 %625 }
 0x71e   : > { %v627_v18 = vsub.f32 %v619_v11, %v626_v16 }
 0x720   : > { %v628_v19 = vmul.f32 1.442695, %v627_v18 }
 0x721   : > { %v637_v20 = vpop.permute.xlu0 %636 }
 0x722   : > { %2573 = vpow2.f32 %v628_v19  ;;  %v642_v21 = vsel %vm530_vm6, %v637_v20, 0 }
 0x723   : > { %2305 = vmatpush3.bf16.msra.mxu1 %v642_v21 }
 0x724   : > { %2310 = vmatprep.subr.bf16.mxu1 %v2673_v2 }
 0x725   : > { %v685_v29 = vpop.permute.xlu0 %684 }
 0x729   : > { %v797_v31 = vpop.permute.xlu0 %796 }
 0x72a   : > { %v802_v32 = vsel %vm466_vm4, %v797_v31, 0  ;;  %v980_v31 = vsub.s32 2, %v2842_v35 }
 0x72d   : > { %v795_v33 = vpop.permute.xlu0 %794 }
 0x72f   : > { %v2574_v22 = vpop.eup %2573 }
 0x730   : > { %v630_v23 = vsel %vm466_vm4, %v2574_v22, 0.0 }
 0x731   : > { %631 = vadd.xlane.f32.xlu1 %v630_v23 }
 0x742   : > { %686 = vrot.lane.b32.xlu1 %v2851_v42, %s2685_s13 }
 0x7ba   : > { %v632_v24 = vpop.xlane.xlu1 %631 }
 0x7bb   : > { %2575 = vrcp.f32 %v632_v24 }
 0x7be   : > { %v687_v27 = vpop.permute.xlu1 %686 }
 0x7bf   : > { %v692_v30 = vsel %vm466_vm4, %v687_v27, 0 }
 0x7c8   : > { %v2576_v25 = vpop.eup %2575 }
 0x7c9   : > { %v634_v26 = vmul.f32 %v2576_v25, %v2574_v22 }
 0x7cb   : > { %v635_v28 = vpack.c.bf16 %v634_v26, %v634_v26 }
 0x7cd   : > { %2307 = vmatmul.mubr.msk.bf16.vlgmr.msra.gmra.mxu1 %vm466_vm4, %v635_v28 }
 0x7ce   : > { %2311 = vmatpush3.bf16.xpose.msra.mxu1 %v692_v30  ;;  %2312 = vmatprep.mubr.msk.bf16.mxu1 %vm2674_vm0, %v2673_v2 }
 0x7cf   : > { %2322 = vmatprep.subr.bf16.mxu1 %v2673_v2 }
 0x7d5   : > { %2313 = vmatmul.mubr.msk.bf16.vlgmr.msra.gmra.mxu1 %vm466_vm4, %v685_v29 }
 0x7d6   : > { %2323 = vmatpush3.bf16.xpose.msra.mxu1 %v802_v32  ;;  %2324 = vmatprep.mubr.msk.bf16.mxu1 %vm2674_vm0, %v2673_v2  ;;  %v981_v32 = vrot.slane %v2848_v37, %v980_v31 }
 0x7d7   : > { %2334 = vmatprep.subr.bf16.mxu1 %v2673_v2 }
 0x7dd   : > { %2325 = vmatmul.mubr.msk.bf16.vlgmr.msra.gmra.mxu1 %vm466_vm4, %v795_v33 }
 0x7de   : > { %2338 = vmatprep.mubr.msk.bf16.mxu1 %vm2674_vm0, %v2673_v2  ;;  %2335 = vmatpush3.bf16.msra.mxu1 %v2539_v13 }
 0x7df   : > { %2336 = vmatprep.subr.bf16.mxu1 %v2673_v2 }
 0x7e2   : > { %2337 = vmatpush3.bf16.msra.mxu1 %v2540_v14 }
 0x7e3   : > { %2350 = vmatprep.subr.bf16.mxu1 %v2673_v2 }
 0x88d   : > { %v678_v34 = vpop.f32.mrf.mxu1 }
 0x88f   : > { %v2308_v36 = vpop.f32.mrf.mxu1 }
 0x891   : > { %v681_v38 = vpop.f32.mrf.mxu1 }
 0x893   : > { %v2309_v39 = vpop.f32.mrf.mxu1 }
 0x895   : > { %v728_v40 = vpop.f32.mrf.mxu1 }
 0x896   : > { %v729_v41 = vadd.f32 %v728_v40, %v2862_v48 }
 0x897   : > { %v2314_v43 = vpop.f32.mrf.mxu1 }
 0x898   : > { %v734_v44 = vsel %vm466_vm4, %v729_v41, -inf }
 0x899   : > { %735 = vmax.xlane.f32.xlu1 %v734_v44  ;;  %v731_v45 = vpop.f32.mrf.mxu1 }
 0x89b   : > { %v2315_v46 = vpop.f32.mrf.mxu1 }
 0x89d   : > { %v838_v47 = vpop.f32.mrf.mxu1 }
 0x89e   : > { %v839_v49 = vadd.f32 %v838_v47, %v2862_v48  ;;  %v2542_v47 = vld [vmem:[%s3239_s2 + $0x8] ss:$28 sps:$4 sm:$0xff]  }
 0x89f   : > { %v2326_v50 = vpop.f32.mrf.mxu1 }
 0x8a0   : > { %v844_v51 = vsel %vm466_vm4, %v839_v49, -inf  ;;  %v2544_v50 = vld [vmem:[%s3240_s3 + $0x70] sm:$0xff]  }
 0x8a1   : > { %845 = vmax.xlane.f32.xlu0 %v844_v51  ;;  %v841_v52 = vpop.f32.mrf.mxu1  ;;  %v2545_v51 = vld [vmem:[%s3240_s3 + $0x68] sm:$0xff]  }
 0x8a2   : > { %v2546_v52 = vld [vmem:[%s3240_s3 + $0x60] sm:$0xff]  }
 0x8a3   : > { %v2327_v53 = vpop.f32.mrf.mxu1 }
 0x8a4   : > { %v2547_v53 = vld [vmem:[%s3240_s3 + $0x58] sm:$0xff]  }
 0x922   : > { %v736_v54 = vpop.xlane.xlu1 %735 }
 0x923   : > { %v737_v55 = vsub.f32 %v729_v41, %v736_v54  ;;  %v2548_v54 = vld [vmem:[%s3240_s3 + $0x50] sm:$0xff]  }
 0x925   : > { %v738_v56 = vmul.f32 1.442695, %v737_v55 }
 0x927   : > { %2577 = vpow2.f32 %v738_v56 }
 0x92a   : > { %v846_v57 = vpop.xlane.xlu0 %845 }
 0x92b   : > { %v847_v58 = vsub.f32 %v839_v49, %v846_v57  ;;  %v2543_v49 = vld [vmem:[%s3240_s3 + $0x78] sm:$0xff]  }
 0x92d   : > { %v848_v59 = vmul.f32 1.442695, %v847_v58 }
 0x92f   : > { %2579 = vpow2.f32 %v848_v59 }
 0x934   : > { %v2578_v60 = vpop.eup %2577 }
 0x935   : > { %v740_v61 = vsel %vm466_vm4, %v2578_v60, 0.0 }
 0x936   : > { %741 = vadd.xlane.f32.xlu0 %v740_v61  ;;  %v2549_v61 = vld [vmem:[%s3240_s3 + $0x48] sm:$0xff]  }
 0x93c   : > { %v2580_v62 = vpop.eup %2579 }
 0x93d   : > { %v850_v63 = vsel %vm466_vm4, %v2580_v62, 0.0 }
 0x93e   : > { %851 = vadd.xlane.f32.xlu1 %v850_v63  ;;  %v999_v63 = vsub.s32 3, %v2842_v35 }
 0x94c   : > { %746 = vrot.lane.b32.xlu0 %v2851_v42, %s3246_s14 }
 0x94f   : > { %856 = vrot.lane.b32.xlu1 %v2851_v42, %s3247_s7 }
 0x953   : > { %905 = vrot.lane.b32.xlu1 %v678_v34, %s3243_s10  ;;  %s3245_s10 = smov 16  }
 0x9bf   : > { %v742_v0 = vpop.xlane.xlu0 %741 }
 0x9c0   : > { %2581 = vrcp.f32 %v742_v0  ;;  %v1000_v0 = vrot.slane %v2848_v37, %v999_v63 }
 0x9c3   : > { %v747_v1 = vpop.permute.xlu0 %746 }
 0x9c4   : > { %v752_v3 = vsel %vm530_vm6, %v747_v1, 0 }
 0x9c5   : > { %2317 = vmatpush3.bf16.msra.mxu0 %v752_v3 }
 0x9c6   : > { %2328 = vmatprep.subr.bf16.mxu0 %v2673_v2 }
 0x9c7   : > { %v852_v4 = vpop.xlane.xlu1 %851 }
 0x9c8   : > { %2583 = vrcp.f32 %v852_v4 }
 0x9cb   : > { %v857_v8 = vpop.permute.xlu1 %856 }
 0x9cc   : > { %v862_v10 = vsel %vm530_vm6, %v857_v8, 0 }
 0x9cd   : > { %v2582_v5 = vpop.eup %2581 }
 0x9ce   : > { %v744_v7 = vmul.f32 %v2582_v5, %v2578_v60 }
 0x9cf   : > { %v906_v24 = vpop.permute.xlu1 %905 }
 0x9d0   : > { %v745_v9 = vpack.c.bf16 %v744_v7, %v744_v7  ;;  %v916_v26 = vsel %vm466_vm4, %v2883_v6, %v906_v24  ;;  %v2551_v24 = vld [vmem:[%s3239_s2 + $0x44] ss:$28 sps:$4 sm:$0xff]  }
 0x9d2   : > { %2319 = vmatmul.mubr.msk.bf16.vlgmr.msra.gmra.mxu0 %vm466_vm4, %v745_v9 }
 0x9d3   : > { %2329 = vmatpush3.bf16.msra.mxu0 %v862_v10  ;;  %2330 = vmatprep.mubr.msk.bf16.mxu0 %vm2674_vm0, %v2673_v2  ;;  %v1149_v10 = vsub.s32 4, %v2842_v35 }
 0x9d4   : > { %2342 = vmatprep.subr.bf16.mxu0 %v2673_v2 }
 0x9d5   : > { %v2584_v42 = vpop.eup %2583 }
 0x9d6   : > { %v854_v11 = vmul.f32 %v2584_v42, %v2580_v62  ;;  %v2550_v62 = vld [vmem:[%s3240_s3 + $0x40] sm:$0xff]   ;;  %v1150_v42 = vrot.slane %v2848_v37, %v1149_v10 }
 0x9d8   : > { %v855_v12 = vpack.c.bf16 %v854_v11, %v854_v11 }
 0x9da   : > { %2331 = vmatmul.mubr.msk.bf16.vlgmr.msra.gmra.mxu0 %vm466_vm4, %v855_v12 }
 0x9db   : > { %2346 = vmatprep.mubr.msk.bf16.mxu0 %vm2674_vm0, %v2673_v2 }
 0xa92   : > { %v788_v15 = vpop.f32.mrf.mxu0 }
 0xa93   : > { %909 = vrot.lane.b32.xlu0 %v788_v15, %s3245_s10 }
 0xa94   : > { %v2320_v16 = vpop.f32.mrf.mxu0 }
 0xa96   : > { %v791_v18 = vpop.f32.mrf.mxu0 }
 0xa98   : > { %v2321_v19 = vpop.f32.mrf.mxu0 }
 0xa9a   : > { %v898_v20 = vpop.f32.mrf.mxu0 }
 0xa9b   : > { %913 = vrot.lane.b32.xlu1 %v898_v20, %s3244_s15  ;;  %s3256_s15 = smov 24  }
 0xa9c   : > { %v2332_v21 = vpop.f32.mrf.mxu0 }
 0xa9e   : > { %v901_v22 = vpop.f32.mrf.mxu0 }
 0xaa0   : > { %v2333_v23 = vpop.f32.mrf.mxu0 }
 0xb05   : > { %v910_v25 = vpop.permute.xlu0 %909 }
 0xb06   : > { %v918_v27 = vsel %vm917_vm7, %v916_v26, %v910_v25  ;;  %v2552_v25 = vld [vmem:[%s3239_s2 + $0xc] ss:$28 sps:$4 sm:$0xff]  }
 0xb0d   : > { %v914_v28 = vpop.permute.xlu1 %913 }
 0xb0e   : > { %v920_v29 = vsel %vm919_vm8, %v918_v27, %v914_v28 }
 0xb0f   : > { %v921_v30 = vpack.c.bf16 %v920_v29, %v920_v29 }
 0xb11   : > { %2339 = vmatmul.mubr.msk.bf16.vlgmr.msra.gmra.mxu1 %vm387_vm3, %v921_v30 }
 0xb12   : > { %2366 = vmatprep.mubr.msk.bf16.mxu1 %vm2674_vm0, %v2673_v2  ;;  %2351 = vmatpush3.bf16.msra.mxu1 %v2543_v49 }
 0xb13   : > { %2352 = vmatprep.subr.bf16.mxu1 %v2673_v2 }
 0xb16   : > { %2353 = vmatpush3.bf16.msra.mxu1 %v2544_v50 }
 0xb17   : > { %2354 = vmatprep.subr.bf16.mxu1 %v2673_v2 }
 0xb1a   : > { %2355 = vmatpush3.bf16.msra.mxu1 %v2545_v51 }
 0xb1b   : > { %2356 = vmatprep.subr.bf16.mxu1 %v2673_v2 }
 0xb1e   : > { %2357 = vmatpush3.bf16.msra.mxu1 %v2546_v52 }
 0xb1f   : > { %2358 = vmatprep.subr.bf16.mxu1 %v2673_v2 }
 0xb22   : > { %2359 = vmatpush3.bf16.msra.mxu1 %v2547_v53 }
 0xb23   : > { %2360 = vmatprep.subr.bf16.mxu1 %v2673_v2 }
 0xb26   : > { %2361 = vmatpush3.bf16.msra.mxu1 %v2548_v54 }
 0xb27   : > { %2362 = vmatprep.subr.bf16.mxu1 %v2673_v2 }
 0xb2a   : > { %2363 = vmatpush3.bf16.msra.mxu1 %v2549_v61 }
 0xb2b   : > { %2364 = vmatprep.subr.bf16.mxu1 %v2673_v2 }
 0xb2e   : > { %2365 = vmatpush3.bf16.msra.mxu1 %v2550_v62 }
 0xb2f   : > { %2396 = vmatprep.subr.bf16.mxu1 %v2673_v2 }
 0xbd1   : > { %v971_v33 = vpop.f32.mrf.mxu1 }
 0xbd2   : > { %v977_v34 = vadd.f32 %v971_v33, %v2825_v17  ;;  %v2541_v17 = vld [vmem:[%s3239_s2 + $0x40] ss:$28 sps:$4 sm:$0xff]  }
 0xbd3   : > { %v2340_v36 = vpop.f32.mrf.mxu1  ;;  %2343 = vmatpush3.bf16.msra.mxu0 %v2541_v17 }
 0xbd4   : > { %v2954_v6 = vadd.f32 %v981_v32, %v977_v34  ;;  %2344 = vmatprep.subr.bf16.mxu0 %v2673_v2  ;;  %v1196_v32 = vsub.s32 5, %v2842_v35 }
 0xbd5   : > { %v974_v38 = vpop.f32.mrf.mxu1 }
 0xbd6   : > { %v983_v39 = vsel %vm387_vm3, %v2954_v6, 0.0  ;;  %v1197_v33 = vrot.slane %v2848_v37, %v1196_v32 }
 0xbd7   : > { %984 = vadd.xlane.f32.xlu0 %v983_v39  ;;  %v2341_v40 = vpop.f32.mrf.mxu1  ;;  %2345 = vmatpush3.bf16.msra.mxu0 %v2542_v47 }
 0xbd8   : > { %2370 = vmatprep.subr.bf16.mxu0 %v2673_v2 }
 0xc60   : > { %v985_v41 = vpop.xlane.xlu0 %984 }
 0xc61   : > { %v986_v43 = vmul.f32 0.03125, %v985_v41 }
 0xc63   : > { %v987_v44 = vsub.f32 %v2954_v6, %v986_v43 }
 0xc65   : > { %v988_v45 = vmul.f32 %v987_v44, %v987_v44 }
 0xc67   : > { %v989_v46 = vsel %vm387_vm3, %v988_v45, 0.0 }
 0xc68   : > { %990 = vadd.xlane.f32.xlu1 %v989_v46 }
 0xcf1   : > { %v991_v55 = vpop.xlane.xlu1 %990 }
 0xcf2   : > { %v992_v56 = vmul.f32 0.03125, %v991_v55 }
 0xcf4   : > { %v993_v57 = vadd.f32 1e-05, %v992_v56 }
 0xcf6   : > { %2585 = vrsqrt.f32 %v993_v57 }
 0xd03   : > { %v2586_v58 = vpop.eup %2585 }
 0xd04   : > { %v995_v59 = vmul.f32 %v2586_v58, %v987_v44 }
 0xd06   : > { %v996_v60 = vpack.c.bf16 %v995_v59, %v995_v59 }
 0xd08   : > { %2347 = vmatmul.mubr.msk.bf16.vlgmr.msra.gmra.mxu0 %vm387_vm3, %v996_v60 }
 0xd09   : > { %2374 = vmatprep.mubr.msk.bf16.mxu0 %vm2674_vm0, %v2673_v2  ;;  %2371 = vmatpush3.bf16.msra.mxu0 %v2551_v24 }
 0xd0a   : > { %2372 = vmatprep.subr.bf16.mxu0 %v2673_v2 }
 0xd0d   : > { %2373 = vmatpush3.bf16.msra.mxu0 %v2552_v25 }
 0xd0e   : > { %2378 = vmatprep.subr.bf16.mxu0 %v2673_v2 }
 0xdc8   : > { %v1050_v1 = vpop.f32.mrf.mxu0 }
 0xdc9   : > { %v1051_v3 = vadd.f32 %v1050_v1, %v1000_v0 }
 0xdca   : > { %v2348_v4 = vpop.f32.mrf.mxu0 }
 0xdcb   : > { %v1056_v5 = vmax.f32 %v1051_v3, 0.0 }
 0xdcc   : > { %v1053_v7 = vpop.f32.mrf.mxu0 }
 0xdcd   : > { %v1057_v8 = vpack.c.bf16 %v1056_v5, %v1056_v5 }
 0xdce   : > { %v2349_v9 = vpop.f32.mrf.mxu0 }
 0xdcf   : > { %2367 = vmatmul.mubr.bf16.vlgmr.msra.gmra.mxu1 %v1057_v8 }
 0xdd0   : > { %2398 = vmatprep.mubr.msk.bf16.mxu1 %vm2674_vm0, %v2673_v2 }
 0xe8f   : > { %v1140_v11 = vpop.f32.mrf.mxu1 }
 0xe90   : > { %v1146_v12 = vadd.f32 %v1140_v11, %v2954_v6 }
 0xe91   : > { %v2368_v13 = vpop.f32.mrf.mxu1 }
 0xe92   : > { %v3010_v14 = vadd.f32 %v1150_v42, %v1146_v12 }
 0xe93   : > { %v1143_v15 = vpop.f32.mrf.mxu1 }
 0xe94   : > { %v1180_v16 = vsel %vm387_vm3, %v3010_v14, 0.0 }
 0xe95   : > { %1181 = vadd.xlane.f32.xlu0 %v1180_v16  ;;  %v2369_v18 = vpop.f32.mrf.mxu1 }
 0xf1e   : > { %v1182_v19 = vpop.xlane.xlu0 %1181 }
 0xf1f   : > { %v1183_v20 = vmul.f32 0.03125, %v1182_v19 }
 0xf21   : > { %v1184_v21 = vsub.f32 %v3010_v14, %v1183_v20 }
 0xf23   : > { %v1185_v22 = vmul.f32 %v1184_v21, %v1184_v21 }
 0xf25   : > { %v1186_v23 = vsel %vm387_vm3, %v1185_v22, 0.0 }
 0xf26   : > { %1187 = vadd.xlane.f32.xlu0 %v1186_v23 }
 0xfaf   : > { %v1188_v26 = vpop.xlane.xlu0 %1187 }
 0xfb0   : > { %v1189_v27 = vmul.f32 0.03125, %v1188_v26 }
 0xfb2   : > { %v1190_v28 = vadd.f32 1e-05, %v1189_v27 }
 0xfb4   : > { %2587 = vrsqrt.f32 %v1190_v28 }
 0xfc1   : > { %v2588_v29 = vpop.eup %2587 }
 0xfc2   : > { %v1192_v30 = vmul.f32 %v2588_v29, %v1184_v21 }
 0xfc4   : > { %v1193_v31 = vpack.c.bf16 %v1192_v30, %v1192_v30 }
 0xfc6   : > { %2375 = vmatmul.mubr.msk.bf16.vlgmr.msra.gmra.mxu0 %vm387_vm3, %v1193_v31 }
 0xfc7   : > { %2380 = vmatprep.mubr.msk.bf16.mxu0 %vm2674_vm0, %v2673_v2 }
0x1086   : > { %v1247_v34 = vpop.f32.mrf.mxu0 }
0x1087   : > { %v1248_v36 = vadd.f32 %v1247_v34, %v1197_v33 }
0x1088   : > { %v2376_v6 = vpop.f32.mrf.mxu0 }
0x1089   : > { %v3029_v38 = vpack.c.bf16 %v1248_v36, %v1248_v36 }
0x108a   : > { %v1250_v39 = vpop.f32.mrf.mxu0 }
0x108b   : > { %1255 = vrot.lane.b32.xlu1 %v3029_v38, %s2676_s25  ;;  %s3251_s25 = smov 56  }
0x108c   : > { %v2377_v40 = vpop.f32.mrf.mxu0 }
0x108f   : > { %1365 = vrot.lane.b32.xlu1 %v3029_v38, %s2678_s26  ;;  %s3252_s26 = smov 40  }
0x1093   : > { %1363 = vrot.lane.b32.xlu1 %v3029_v38, %s2680_s6 }
0x1097   : > { %1475 = vrot.lane.b32.xlu1 %v3029_v38, %s2685_s13 }
0x109b   : > { %1473 = vrot.lane.b32.xlu1 %v3029_v38, %s2682_s9 }
0x109f   : > { %1583 = vrot.lane.b32.xlu1 %v3029_v38, %s2684_s12  ;;  %s226_s12 = sand.u32 1, %s2662_s19  }
0x10a0   : > { %s2106_s13 = sshll.u32 %s226_s12, 3  ;;  %s2018_s7 = scalar_lea.sflag [#allocation3], %s226_s12 }
0x10fd   : > { %v1256_v41 = vpop.permute.xlu1 %1255 }
0x10fe   : > { %v1261_v43 = vsel %vm466_vm4, %v1256_v41, 0 }
0x10ff   : > { %2379 = vmatpush3.bf16.xpose.msra.mxu0 %v1261_v43 }
0x1100   : > { %2384 = vmatprep.subr.bf16.mxu0 %v2673_v2 }
0x1101   : > { %v1366_v58 = vpop.permute.xlu1 %1365 }
0x1102   : > { %v1371_v63 = vsel %vm466_vm4, %v1366_v58, 0 }
0x1105   : > { %v1364_v62 = vpop.permute.xlu1 %1363 }
0x1106   : > { %2381 = vmatmul.mubr.msk.bf16.vlgmr.msra.gmra.mxu0 %vm466_vm4, %v3029_v38 }
0x1107   : > { %2386 = vmatprep.mubr.msk.bf16.mxu0 %vm2674_vm0, %v2673_v2 }
0x1109   : > { %v1476_v0 = vpop.permute.xlu1 %1475 }
0x110a   : > { %v1481_v1 = vsel %vm466_vm4, %v1476_v0, 0 }
0x110d   : > { %v1474_v4 = vpop.permute.xlu1 %1473 }
0x1111   : > { %v1584_v7 = vpop.permute.xlu1 %1583 }
0x11c6   : > { %v1297_v44 = vpop.f32.mrf.mxu0 }
0x11c7   : > { %v1298_v45 = vadd.f32 %v1297_v44, %v2862_v48 }
0x11c8   : > { %v2382_v46 = vpop.f32.mrf.mxu0 }
0x11c9   : > { %v1303_v17 = vsel %vm466_vm4, %v1298_v45, -inf }
0x11ca   : > { %1304 = vmax.xlane.f32.xlu0 %v1303_v17  ;;  %v1300_v47 = vpop.f32.mrf.mxu0 }
0x11cc   : > { %v2383_v49 = vpop.f32.mrf.mxu0 }
0x1253   : > { %v1305_v50 = vpop.xlane.xlu0 %1304 }
0x1254   : > { %v1306_v51 = vsub.f32 %v1298_v45, %v1305_v50 }
0x1256   : > { %v1307_v52 = vmul.f32 1.442695, %v1306_v51 }
0x1258   : > { %2589 = vpow2.f32 %v1307_v52 }
0x1265   : > { %v2590_v53 = vpop.eup %2589 }
0x1266   : > { %v1309_v54 = vsel %vm466_vm4, %v2590_v53, 0.0 }
0x1267   : > { %1310 = vadd.xlane.f32.xlu0 %v1309_v54 }
0x127d   : > { %1315 = vrot.lane.b32.xlu0 %v3029_v38, %s2679_s30  ;;  %s3253_s30 = smov 48  }
0x1281   : > { %1585 = vrot.lane.b32.xlu0 %v3029_v38, %s2683_s11  ;;  %s3254_s11 = smov 8  }
0x12f0   : > { %v1311_v55 = vpop.xlane.xlu0 %1310 }
0x12f1   : > { %2591 = vrcp.f32 %v1311_v55 }
0x12f4   : > { %v1316_v56 = vpop.permute.xlu0 %1315 }
0x12f5   : > { %v1321_v57 = vsel %vm530_vm6, %v1316_v56, 0 }
0x12f6   : > { %2385 = vmatpush3.bf16.msra.mxu0 %v1321_v57 }
0x12f7   : > { %2390 = vmatprep.subr.bf16.mxu0 %v2673_v2 }
0x12f8   : > { %v1586_v3 = vpop.permute.xlu0 %1585 }
0x12f9   : > { %v1591_v5 = vsel %vm466_vm4, %v1586_v3, 0 }
0x12fe   : > { %v2592_v59 = vpop.eup %2591 }
0x12ff   : > { %v1313_v60 = vmul.f32 %v2592_v59, %v2590_v53 }
0x1301   : > { %v1314_v61 = vpack.c.bf16 %v1313_v60, %v1313_v60 }
0x1303   : > { %2387 = vmatmul.mubr.msk.bf16.vlgmr.msra.gmra.mxu0 %vm466_vm4, %v1314_v61 }
0x1304   : > { %2391 = vmatpush3.bf16.xpose.msra.mxu0 %v1371_v63  ;;  %2392 = vmatprep.mubr.msk.bf16.mxu0 %vm2674_vm0, %v2673_v2 }
0x1305   : > { %2402 = vmatprep.subr.bf16.mxu0 %v2673_v2 }
0x130b   : > { %2393 = vmatmul.mubr.msk.bf16.vlgmr.msra.gmra.mxu0 %vm466_vm4, %v1364_v62 }
0x130c   : > { %2403 = vmatpush3.bf16.xpose.msra.mxu0 %v1481_v1  ;;  %2404 = vmatprep.mubr.msk.bf16.mxu0 %vm2674_vm0, %v2673_v2  ;;  %v2553_v1 = vld [vmem:[%s3239_s2 + $0x48] ss:$28 sps:$4 sm:$0xff]  }
0x130d   : > { %2414 = vmatprep.subr.bf16.mxu0 %v2673_v2 }
0x1313   : > { %2405 = vmatmul.mubr.msk.bf16.vlgmr.msra.gmra.mxu0 %vm466_vm4, %v1474_v4 }
0x1314   : > { %2415 = vmatpush3.bf16.xpose.msra.mxu0 %v1591_v5  ;;  %2416 = vmatprep.mubr.msk.bf16.mxu0 %vm2674_vm0, %v2673_v2  ;;  %v2554_v5 = vld [vmem:[%s3239_s2 + $0x10] ss:$28 sps:$4 sm:$0xff]  }
0x1315   : > { %2426 = vmatprep.subr.bf16.mxu0 %v2673_v2 }
0x131b   : > { %2417 = vmatmul.mubr.msk.bf16.vlgmr.msra.gmra.mxu0 %vm466_vm4, %v1584_v7 }
0x131c   : > { %2430 = vmatprep.mubr.msk.bf16.mxu0 %vm2674_vm0, %v2673_v2  ;;  %2427 = vmatpush3.bf16.msra.mxu0 %v2553_v1  ;;  %v2170_v1 = vld [vmem:[%s3241_s4 + $0x8] ss:$0 sm:$0xff] }
0x131d   : > { %2428 = vmatprep.subr.bf16.mxu0 %v2673_v2 }
0x1320   : > { %2429 = vmatpush3.bf16.msra.mxu0 %v2554_v5 }
0x1321   : > { %2442 = vmatprep.subr.bf16.mxu0 %v2673_v2 }
0x13c3   : > { %v3076_v8 = vpop.f32.mrf.mxu0 }
0x13c5   : > { %v2388_v9 = vpop.f32.mrf.mxu0 }
0x13c7   : > { %v1360_v10 = vpop.f32.mrf.mxu0 }
0x13c9   : > { %v2389_v42 = vpop.f32.mrf.mxu0 }
0x13cb   : > { %v1407_v11 = vpop.f32.mrf.mxu0 }
0x13cc   : > { %v1408_v12 = vadd.f32 %v1407_v11, %v2862_v48 }
0x13cd   : > { %v2394_v13 = vpop.f32.mrf.mxu0 }
0x13ce   : > { %v1413_v15 = vsel %vm466_vm4, %v1408_v12, -inf }
0x13cf   : > { %1414 = vmax.xlane.f32.xlu0 %v1413_v15  ;;  %v1410_v16 = vpop.f32.mrf.mxu0 }
0x13d1   : > { %v2395_v18 = vpop.f32.mrf.mxu0 }
0x13d3   : > { %v1517_v19 = vpop.f32.mrf.mxu0 }
0x13d4   : > { %v1518_v20 = vadd.f32 %v1517_v19, %v2862_v48 }
0x13d5   : > { %v2406_v21 = vpop.f32.mrf.mxu0 }
0x13d6   : > { %v1523_v22 = vsel %vm466_vm4, %v1518_v20, -inf }
0x13d7   : > { %1524 = vmax.xlane.f32.xlu1 %v1523_v22  ;;  %v1520_v23 = vpop.f32.mrf.mxu0 }
0x13d9   : > { %v2407_v24 = vpop.f32.mrf.mxu0 }
0x13db   : > { %v1627_v25 = vpop.f32.mrf.mxu0 }
0x13dc   : > { %v1628_v26 = vadd.f32 %v1627_v25, %v2862_v48 }
0x13dd   : > { %v2418_v27 = vpop.f32.mrf.mxu0 }
0x13de   : > { %v1633_v28 = vsel %vm466_vm4, %v1628_v26, -inf }
0x13df   : > { %1634 = vmax.xlane.f32.xlu0 %v1633_v28  ;;  %v1630_v29 = vpop.f32.mrf.mxu0 }
0x13e1   : > { %v2419_v30 = vpop.f32.mrf.mxu0 }
0x13e8   : > { %1425 = vrot.lane.b32.xlu1 %v3029_v38, %s3251_s25 }
0x1458   : > { %v1415_v31 = vpop.xlane.xlu0 %1414 }
0x1459   : > { %v1416_v32 = vsub.f32 %v1408_v12, %v1415_v31 }
0x145b   : > { %v1417_v33 = vmul.f32 1.442695, %v1416_v32 }
0x145d   : > { %2593 = vpow2.f32 %v1417_v33 }
0x1460   : > { %v1525_v34 = vpop.xlane.xlu1 %1524 }
0x1461   : > { %v1526_v36 = vsub.f32 %v1518_v20, %v1525_v34 }
0x1463   : > { %v1527_v6 = vmul.f32 1.442695, %v1526_v36 }
0x1464   : > { %v1426_v39 = vpop.permute.xlu1 %1425 }
0x1465   : > { %2595 = vpow2.f32 %v1527_v6  ;;  %v1431_v48 = vsel %vm530_vm6, %v1426_v39, 0 }
0x1466   : > { %2397 = vmatpush3.bf16.msra.mxu1 %v1431_v48 }
0x1467   : > { %2408 = vmatprep.subr.bf16.mxu1 %v2673_v2 }
0x1468   : > { %v1635_v40 = vpop.xlane.xlu0 %1634 }
0x1469   : > { %v1636_v41 = vsub.f32 %v1628_v26, %v1635_v40  ;;  %v1767_v26 = vsub.s32 6, %v2842_v35  ;;  %v2557_v40 = vld [vmem:[%s3240_s3 + $0xb8] sm:$0xff]  }
0x146a   : > { %v2594_v43 = vpop.eup %2593 }
0x146b   : > { %v1637_v44 = vmul.f32 1.442695, %v1636_v41  ;;  %v1419_v45 = vsel %vm466_vm4, %v2594_v43, 0.0  ;;  %v1768_v27 = vrot.slane %v2848_v37, %v1767_v26  ;;  %v2555_v37 = vld [vmem:[%s3239_s2 + $0x4c] ss:$28 sps:$4 sm:$0xff]   ;;  %v2558_v41 = vld [vmem:[%s3240_s3 + $0xb0] sm:$0xff]  }
0x146c   : > { %1420 = vadd.xlane.f32.xlu0 %v1419_v45  ;;  %v2561_v45 = vld [vmem:[%s3240_s3 + $0x98] sm:$0xff]  }
0x146d   : > { %2597 = vpow2.f32 %v1637_v44  ;;  %v2560_v44 = vld [vmem:[%s3240_s3 + $0xa0] sm:$0xff]  }
0x1472   : > { %v2596_v46 = vpop.eup %2595 }
0x1473   : > { %v1529_v17 = vsel %vm466_vm4, %v2596_v46, 0.0 }
0x1474   : > { %1530 = vadd.xlane.f32.xlu1 %v1529_v17 }
0x147a   : > { %v2598_v47 = vpop.eup %2597 }
0x147b   : > { %v1639_v49 = vsel %vm466_vm4, %v2598_v47, 0.0 }
0x147c   : > { %1640 = vadd.xlane.f32.xlu0 %v1639_v49 }
0x1485   : > { %1645 = vrot.lane.b32.xlu1 %v3029_v38, %s3252_s26 }
0x1492   : > { %1535 = vrot.lane.b32.xlu0 %v3029_v38, %s3253_s30 }
0x14f5   : > { %v1421_v50 = vpop.xlane.xlu0 %1420 }
0x14f6   : > { %2599 = vrcp.f32 %v1421_v50 }
0x14fd   : > { %v1531_v51 = vpop.xlane.xlu1 %1530 }
0x14fe   : > { %2601 = vrcp.f32 %v1531_v51 }
0x1501   : > { %v1646_v59 = vpop.permute.xlu1 %1645 }
0x1502   : > { %v1651_v61 = vsel %vm530_vm6, %v1646_v59, 0 }
0x1503   : > { %v2600_v52 = vpop.eup %2599 }
0x1504   : > { %v1423_v53 = vmul.f32 %v2600_v52, %v2594_v43  ;;  %v2559_v43 = vld [vmem:[%s3240_s3 + $0xa8] sm:$0xff]  }
0x1505   : > { %v1641_v54 = vpop.xlane.xlu0 %1640 }
0x1506   : > { %2603 = vrcp.f32 %v1641_v54  ;;  %v1424_v55 = vpack.c.bf16 %v1423_v53, %v1423_v53  ;;  %v2563_v53 = vld [vmem:[%s3240_s3 + $0x88] sm:$0xff]   ;;  %v2564_v54 = vld [vmem:[%s3240_s3 + $0x80] sm:$0xff]  }
0x1508   : > { %2399 = vmatmul.mubr.msk.bf16.vlgmr.msra.gmra.mxu1 %vm466_vm4, %v1424_v55  ;;  %v1786_v55 = vsub.s32 7, %v2842_v35 }
0x1509   : > { %v1536_v56 = vpop.permute.xlu0 %1535  ;;  %2410 = vmatprep.mubr.msk.bf16.mxu1 %vm2674_vm0, %v2673_v2 }
0x150a   : > { %v1541_v57 = vsel %vm530_vm6, %v1536_v56, 0  ;;  %v2609_v56 = vld [vmem:[%s3241_s4] sm:$0xff] }
0x150b   : > { %v2602_v58 = vpop.eup %2601  ;;  %2409 = vmatpush3.bf16.msra.mxu1 %v1541_v57  ;;  %v1787_v57 = vrot.slane %v2609_v56, %v1786_v55 }
0x150c   : > { %2420 = vmatprep.subr.bf16.mxu1 %v2673_v2  ;;  %v1533_v38 = vmul.f32 %v2602_v58, %v2596_v46  ;;  %v2562_v46 = vld [vmem:[%s3240_s3 + $0x90] sm:$0xff]  }
0x150e   : > { %v1534_v60 = vpack.c.bf16 %v1533_v38, %v1533_v38 }
0x1510   : > { %2411 = vmatmul.mubr.msk.bf16.vlgmr.msra.gmra.mxu1 %vm466_vm4, %v1534_v60 }
0x1511   : > { %2421 = vmatpush3.bf16.msra.mxu1 %v1651_v61  ;;  %2422 = vmatprep.mubr.msk.bf16.mxu1 %vm2674_vm0, %v2673_v2 }
0x1512   : > { %2434 = vmatprep.subr.bf16.mxu1 %v2673_v2 }
0x1513   : > { %v2604_v62 = vpop.eup %2603 }
0x1514   : > { %v1643_v63 = vmul.f32 %v2604_v62, %v2598_v47 }
0x1516   : > { %v1644_v0 = vpack.c.bf16 %v1643_v63, %v1643_v63 }
0x1518   : > { %2423 = vmatmul.mubr.msk.bf16.vlgmr.msra.gmra.mxu1 %vm466_vm4, %v1644_v0 }
0x1519   : > { %2438 = vmatprep.mubr.msk.bf16.mxu1 %vm2674_vm0, %v2673_v2  ;;  %2435 = vmatpush3.bf16.msra.mxu1 %v2555_v37 }
0x151a   : > { %2436 = vmatprep.subr.bf16.mxu1 %v2673_v2 }
0x15c8   : > { %v1467_v3 = vpop.f32.mrf.mxu1 }
0x15c9   : > { %1694 = vrot.lane.b32.xlu1 %v1467_v3, %s3254_s11 }
0x15ca   : > { %v2400_v4 = vpop.f32.mrf.mxu1 }
0x15cc   : > { %v1470_v7 = vpop.f32.mrf.mxu1 }
0x15ce   : > { %v2401_v9 = vpop.f32.mrf.mxu1 }
0x15d0   : > { %v1577_v10 = vpop.f32.mrf.mxu1 }
0x15d1   : > { %1698 = vrot.lane.b32.xlu0 %v1577_v10, %s3255_s16  ;;  %s2175_s16 = sshll.u32 %s2743_s22, 7  ;;  %s2691_s22 = smov [#allocation2]  }
0x15d2   : > { %v2412_v42 = vpop.f32.mrf.mxu1  ;;  %s3196_s8 = scalar_lea.hbm %s3242_s5, %s2175_s16  ;;  %s2614_s25 = sshll.u32 %s2691_s22, 4  ;;  %s2615_s25 = int_to_ptr.vmem [resolvable:$false] %s2614_s25 }
0x15d3   : > { %s2616_s26 = scalar_lea.vmem %s2615_s25, 256 }
0x15d4   : > { %v1580_v11 = vpop.f32.mrf.mxu1 }
0x15d6   : > { %v2413_v12 = vpop.f32.mrf.mxu1 }
0x15d8   : > { %v1687_v13 = vpop.f32.mrf.mxu1 }
0x15d9   : > { %1702 = vrot.lane.b32.xlu1 %v1687_v13, %s3256_s15  ;;  %s228_s15 = scalar_lea.vmem [#allocation2], %s2106_s13 }
0x15da   : > { %v2424_v15 = vpop.f32.mrf.mxu1  ;;  %s2031_s17 = sshll.u32 %s228_s15, 4  ;;  %s3198_s17 = int_to_ptr.vmem [resolvable:$true] %s2031_s17 }
0x15db   : > { %s2610_s10 = scalar_lea.vmem %s3198_s17, 128  ;;  %p2617_p0 = scmp.lt.s32.totalorder %s3198_s17, %s2615_s25 }
0x15dc   : > { %v1690_v16 = vpop.f32.mrf.mxu1  ;;  %p2611_p11 = scmp.ne.s32.totalorder %s3198_s17, %s2610_s10  ;;  %p2618_p1 = scmp.lt.s32.totalorder %s2616_s26, %s2610_s10 }
0x15dd   : > { %v2565_v16 = vld [vmem:[%s3239_s2 + $0x50] ss:$28 sps:$4 sm:$0xff]  }
0x15de   : > { %v2425_v18 = vpop.f32.mrf.mxu1  ;;  %p2612_p12 = pnand %p2611_p11, %p2760_p5  ;;  %p2619_p2 = por %p2618_p1, %p2617_p0 }
0x15df   : > { %v2566_v18 = vld [vmem:[%s3239_s2 + $0x18] ss:$28 sps:$4 sm:$0xff]  }
0x15e0   : > { %p2613_p13 = pneg %p2612_p12 }
0x15e2   : > { %p2620_p3 = pnand %p2619_p2, %p2613_p13 }
0x163b   : > { %v1695_v19 = vpop.permute.xlu1 %1694 }
0x163c   : > { %v1705_v21 = vsel %vm466_vm4, %v3076_v8, %v1695_v19 }
0x1643   : > { %v1699_v20 = vpop.permute.xlu0 %1698 }
0x1644   : > { %v1706_v22 = vsel %vm917_vm7, %v1705_v21, %v1699_v20 }
0x164b   : > { %v1703_v23 = vpop.permute.xlu1 %1702 }
0x164c   : > { %v1707_v24 = vsel %vm919_vm8, %v1706_v22, %v1703_v23 }
0x164d   : > { %v1708_v25 = vpack.c.bf16 %v1707_v24, %v1707_v24 }
0x164f   : > { %2431 = vmatmul.mubr.msk.bf16.vlgmr.msra.gmra.mxu0 %vm387_vm3, %v1708_v25  ;;  %v1959_v25 = vsub.s32 0, %v2842_v35 }
0x1650   : > { %2458 = vmatprep.mubr.msk.bf16.mxu0 %vm2674_vm0, %v2673_v2  ;;  %2443 = vmatpush3.bf16.msra.mxu0 %v2557_v40 }
0x1651   : > { %2444 = vmatprep.subr.bf16.mxu0 %v2673_v2  ;;  %v1960_v26 = vrot.slane %v2609_v56, %v1959_v25 }
0x1654   : > { %2445 = vmatpush3.bf16.msra.mxu0 %v2558_v41 }
0x1655   : > { %2446 = vmatprep.subr.bf16.mxu0 %v2673_v2 }
0x1658   : > { %2447 = vmatpush3.bf16.msra.mxu0 %v2559_v43 }
0x1659   : > { %2448 = vmatprep.subr.bf16.mxu0 %v2673_v2 }
0x165c   : > { %2449 = vmatpush3.bf16.msra.mxu0 %v2560_v44 }
0x165d   : > { %2450 = vmatprep.subr.bf16.mxu0 %v2673_v2 }
0x1660   : > { %2451 = vmatpush3.bf16.msra.mxu0 %v2561_v45 }
0x1661   : > { %2452 = vmatprep.subr.bf16.mxu0 %v2673_v2 }
0x1664   : > { %2453 = vmatpush3.bf16.msra.mxu0 %v2562_v46 }
0x1665   : > { %2454 = vmatprep.subr.bf16.mxu0 %v2673_v2 }
0x1668   : > { %2455 = vmatpush3.bf16.msra.mxu0 %v2563_v53 }
0x1669   : > { %2456 = vmatprep.subr.bf16.mxu0 %v2673_v2 }
0x166c   : > { %2457 = vmatpush3.bf16.msra.mxu0 %v2564_v54 }
0x170f   : > { %v1758_v28 = vpop.f32.mrf.mxu0 }
0x1710   : > { %v1764_v29 = vadd.f32 %v1758_v28, %v3010_v14  ;;  %v2556_v14 = vld [vmem:[%s3239_s2 + $0x14] ss:$28 sps:$4 sm:$0xff]  }
0x1711   : > { %v2432_v30 = vpop.f32.mrf.mxu0  ;;  %2437 = vmatpush3.bf16.msra.mxu1 %v2556_v14 }
0x1712   : > { %v1769_v8 = vadd.f32 %v1768_v27, %v1764_v29  ;;  %2462 = vmatprep.subr.bf16.mxu1 %v2673_v2 }
0x1713   : > { %v1761_v31 = vpop.f32.mrf.mxu0 }
0x1714   : > { %v1770_v32 = vsel %vm387_vm3, %v1769_v8, 0.0 }
0x1715   : > { %1771 = vadd.xlane.f32.xlu0 %v1770_v32  ;;  %v2433_v33 = vpop.f32.mrf.mxu0 }
0x179e   : > { %v1772_v34 = vpop.xlane.xlu0 %1771 }
0x179f   : > { %v1773_v36 = vmul.f32 0.03125, %v1772_v34 }
0x17a1   : > { %v1774_v6 = vsub.f32 %v1769_v8, %v1773_v36 }
0x17a3   : > { %v1775_v39 = vmul.f32 %v1774_v6, %v1774_v6 }
0x17a5   : > { %v1776_v48 = vsel %vm387_vm3, %v1775_v39, 0.0 }
0x17a6   : > { %1777 = vadd.xlane.f32.xlu1 %v1776_v48 }
0x182f   : > { %v1778_v17 = vpop.xlane.xlu1 %1777 }
0x1830   : > { %v1779_v47 = vmul.f32 0.03125, %v1778_v17 }
0x1832   : > { %v1780_v49 = vadd.f32 1e-05, %v1779_v47 }
0x1834   : > { %2605 = vrsqrt.f32 %v1780_v49 }
0x1841   : > { %v2606_v50 = vpop.eup %2605 }
0x1842   : > { %v1782_v51 = vmul.f32 %v2606_v50, %v1774_v6 }
0x1844   : > { %v1783_v52 = vpack.c.bf16 %v1782_v51, %v1782_v51 }
0x1846   : > { %2439 = vmatmul.mubr.msk.bf16.vlgmr.msra.gmra.mxu1 %vm387_vm3, %v1783_v52 }
0x1847   : > { %2466 = vmatprep.mubr.msk.bf16.mxu1 %vm2674_vm0, %v2673_v2  ;;  %2463 = vmatpush3.bf16.msra.mxu1 %v2565_v16 }
0x1848   : > { %2464 = vmatprep.subr.bf16.mxu1 %v2673_v2 }
0x184b   : > { %2465 = vmatpush3.bf16.msra.mxu1 %v2566_v18 }
0x1906   : > { %v1837_v58 = vpop.f32.mrf.mxu1 }
0x1907   : > { %v1838_v38 = vadd.f32 %v1837_v58, %v1787_v57 }
0x1908   : > { %v2440_v59 = vpop.f32.mrf.mxu1 }
0x1909   : > { %v1843_v60 = vmax.f32 %v1838_v38, 0.0 }
0x190a   : > { %v1840_v61 = vpop.f32.mrf.mxu1 }
0x190b   : > { %v1844_v62 = vpack.c.bf16 %v1843_v60, %v1843_v60 }
0x190c   : > { %v2441_v63 = vpop.f32.mrf.mxu1 }
0x190d   : > { %2459 = vmatmul.mubr.bf16.vlgmr.msra.gmra.mxu0 %v1844_v62 }
0x19cd   : > { %v1927_v0 = vpop.f32.mrf.mxu0 }
0x19ce   : > { %v1933_v3 = vadd.f32 %v1927_v0, %v1769_v8 }
0x19cf   : > { %v2460_v4 = vpop.f32.mrf.mxu0 }
0x19d0   : > { %v1938_v5 = vadd.f32 %v2170_v1, %v1933_v3 }
0x19d1   : > { %v1930_v7 = vpop.f32.mrf.mxu0 }
0x19d2   : > { %v1939_v9 = vsel %vm387_vm3, %v1938_v5, 0.0 }
0x19d3   : > { %1940 = vadd.xlane.f32.xlu0 %v1939_v9  ;;  %v2461_v10 = vpop.f32.mrf.mxu0 }
0x1a5c   : > { %v1941_v42 = vpop.xlane.xlu0 %1940 }
0x1a5d   : > { %v1942_v11 = vmul.f32 0.03125, %v1941_v42 }
0x1a5f   : > { %v1943_v12 = vsub.f32 %v1938_v5, %v1942_v11 }
0x1a61   : > { %v1944_v13 = vmul.f32 %v1943_v12, %v1943_v12 }
0x1a63   : > { %v1945_v15 = vsel %vm387_vm3, %v1944_v13, 0.0 }
0x1a64   : > { %1946 = vadd.xlane.f32.xlu0 %v1945_v15 }
0x1aed   : > { %v1947_v19 = vpop.xlane.xlu0 %1946 }
0x1aee   : > { %v1948_v20 = vmul.f32 0.03125, %v1947_v19 }
0x1af0   : > { %v1949_v21 = vadd.f32 1e-05, %v1948_v20 }
0x1af2   : > { %2607 = vrsqrt.f32 %v1949_v21 }
0x1aff   : > { %v2608_v22 = vpop.eup %2607 }
0x1b00   : > { %v1951_v23 = vmul.f32 %v2608_v22, %v1943_v12 }
0x1b02   : > { %v1952_v24 = vpack.c.bf16 %v1951_v23, %v1951_v23 }
0x1b04   : > { %2467 = vmatmul.mubr.msk.bf16.vlgmr.msra.gmra.mxu1 %vm387_vm3, %v1952_v24 }
0x1bc4   : > { %v2010_v2 = vpop.f32.mrf.mxu1 }
0x1bc5   : > { %v2011_v27 = vadd.f32 %v2010_v2, %v1960_v26 }
0x1bc6   : > { %v2468_v28 = vpop.f32.mrf.mxu1 }
0x1bc7   : > { %2016 = vst [vmem:[%s228_s15] sm:$0xff] %v2011_v27 }
0x1bc8   : > { %v2013_v29 = vpop.f32.mrf.mxu1 }
0x1bc9   : > { %2623 = shalt.err (!%p2620_p3)
}
0x1bca   : > { %s2624_s30 = scalar_lea.hbm %s3196_s8, 128  ;;  %s2628_s11 = scalar_lea.hbm %s3242_s5, 256 }
0x1bcb   : > { %p2625_p4 = scmp.ne.s32.totalorder %s3196_s8, %s2624_s30  ;;  %p2629_p9 = scmp.lt.s32.totalorder %s3196_s8, %s3242_s5 }
0x1bcc   : > { %p2630_p10 = scmp.lt.s32.totalorder %s2628_s11, %s2624_s30 }
0x1bcd   : > { %p2626_p7 = pnand %p2625_p4, %p2760_p5 }
0x1bce   : > { %p2631_p11 = por %p2630_p10, %p2629_p9 }
0x1bcf   : > { %p2627_p8 = pneg %p2626_p7 }
0x1bd1   : > { %p2632_p12 = pnand %p2631_p11, %p2627_p8 }
0x1bd3   : > { %2635 = shalt.err (!%p2632_p12)
}
0x1bd4   : > { %2470 = dma.vmem_to_hbm [thread:$0]  (%p2760_p5), %s3198_s17, 128, %s3196_s8, %s2018_s7   ;;  %v2469_v35 = vpop.f32.mrf.mxu1 }
0x1bd5 PF: > { %p2476_p13 = scmp.ge.s32.totalorder %s2670_s21, 2  ;;  %s2043_s16 = sand.u32 1, %s2658_s18  }
0x1bd6   : > { %s2044_s15 = scalar_lea.sflag [#allocation3], %s2043_s16 }
0x1bd7   : > { %p2473_p0 = pnand %p2476_p13, %p2764_p6 }
0x1bd9   : > { %p2474_p1 = pneg %p2473_p0 }
0x1bdb   : > { %2653 = dma.done.wait (%p2474_p1), %s2044_s15, 128  }
0x1bdc   : > { %2655 = vsyncadd (%p2474_p1), %s2044_s15, 4294967168  ;;  %p15_p2 = scmp.ge.s32.totalorder %s2747_s24, 4   ;;  %s3257_s18 = smov %s2662_s19 }
0x1bdd   : > { %s3258_s19 = smov %s2666_s20  ;;  %s3259_s20 = smov %s2758_s27 }
0x1bde   : > { %s3260_s21 = smov %s2747_s24  ;;  %17 = sbr.rel (!%p15_p2) target bundleno = 3 (0x3), region = 78 }
0x1be3   :  { %2049 = vsyncpa [#allocation3], 1 }
0x1be4   :  { %2051 = vsyncpa [#allocation3 + $0x1], 1 }

</bundles_post_ra>
